<compile_context>
chip_gen: v5e
topology: v5e:2x2
jax: 0.10.0
libtpu: 0.0.40
codegen_flags: <defaults>
</compile_context>

<pallas_src>
import math

import jax
import jax.numpy as jnp
from jax.experimental import pallas as pl
from jax.experimental.pallas import tpu as pltpu

D_MODEL = 32
N_HEADS = 4
D_K = D_MODEL // N_HEADS
D_FF = 64
EPS = 1e-6
NEG_BIG = 1e9


# ---------------------------------------------------------------------------
# In-kernel math helpers (operate on loaded VMEM values)
# ---------------------------------------------------------------------------
def _layer_norm(v, a, b):
    # a * (x - mean) / (std + eps) + b ; unbiased std to match torch.std().
    # Exact division here (approx reciprocal kept only for softmax).
    mean = jnp.mean(v, axis=-1, keepdims=True)
    c = v - mean
    var = jnp.sum(c * c, axis=-1, keepdims=True) * (1.0 / (v.shape[-1] - 1))
    return a * c / (jnp.sqrt(var) + EPS) + b


def _mha(nq, nk, bias, w_ref, b_ref, bd):
    """Head-batched multi-head attention for one batch element.

    nq   : [Tq, D] query-side input (1/sqrt(d_k) already folded into w_ref[0])
    nk   : [Tk, D] key/value-side input
    bias : [Tq, Tk] additive mask bias (0 = keep, -1e9 = masked)
    w_ref: [4, D, D] Ref -> (Wq*scale, Wk, Wv, Wo)
    b_ref: [4, 1, D] Ref
    bd   : [H*Tk, D] block-diagonal head mask, bd[r, d] = (r // Tk == d // d_k)
    """
    q = jnp.dot(nq, w_ref[0], preferred_element_type=jnp.float32) + b_ref[0]
    k = jnp.dot(nk, w_ref[1], preferred_element_type=jnp.float32) + b_ref[1]
    v = jnp.dot(nk, w_ref[2], preferred_element_type=jnp.float32) + b_ref[2]

    # Sublane-tile K/V across heads, then zero the lanes that do not belong to
    # the row's head.  Head h rows of k_bd keep only head h's d_k lanes.
    k_bd = jnp.tile(k, (N_HEADS, 1)) * bd        # [H*Tk, D]
    v_bd = jnp.tile(v, (N_HEADS, 1)) * bd        # [H*Tk, D]

    # Scores of all heads in ONE matmul; contracting dim 1 of both operands
    # avoids any explicit transpose: s[:, h*Tk:(h+1)*Tk] = Q_h @ K_h^T.
    s = jax.lax.dot_general(q, k_bd, (((1,), (1,)), ((), ())),
                            preferred_element_type=jnp.float32)  # [Tq, H*Tk]
    s = s + jnp.tile(bias, (1, N_HEADS))
    # Per-row max over all heads: a constant shift within the row, so every
    # head's softmax is unchanged; one XLU reduce per attention block.
    s = s - jnp.max(s, axis=-1, keepdims=True)
    p = jnp.exp(s)

    # Context lands each head directly in its own d_k lane slot (no concat);
    # per-head softmax denominators via one matmul against the same bd mask.
    ctx = jnp.dot(p, v_bd, preferred_element_type=jnp.float32)    # [Tq, D]
    denom = jnp.dot(p, bd, preferred_element_type=jnp.float32)    # [Tq, D]
    ctx = ctx * pl.reciprocal(denom, approx=True)
    # TODO(synk): attention dropout omitted (eval mode -> identity).
    return jnp.dot(ctx, w_ref[3], preferred_element_type=jnp.float32) + b_ref[3]


# ---------------------------------------------------------------------------
# Pallas kernel: one grid step = full decoder layer for one batch element
# ---------------------------------------------------------------------------
def _decoder_kernel(x_ref, mem_ref, tmask_ref, smask_ref,
                    w_self_ref, b_self_ref, w_src_ref, b_src_ref,
                    ln_a_ref, ln_b_ref,
                    w_ff1_ref, b_ff1_ref, w_ff2_ref, b_ff2_ref,
                    bd_self_ref, bd_src_ref,
                    out_ref):
    x = x_ref[0]           # [T, D]
    mem = mem_ref[0]       # [S, D]

    # Additive mask bias (0 keep / -1e9 masked).  Equivalent to the reference
    # where(mask, scores, -1e9): masked lanes underflow to exp()==0 either way
    # as long as |scores| << 1e9.
    tbias = (tmask_ref[0] - 1.0) * NEG_BIG     # [T, T]
    sbias = (smask_ref[0] - 1.0) * NEG_BIG     # [T, S]

    bd_self = bd_self_ref[...]
    bd_src = bd_src_ref[...]

    # ---- Sublayer 0: x + self_attn(LN(x), LN(x), LN(x), tgt_mask) ----------
    n0 = _layer_norm(x, ln_a_ref[0], ln_b_ref[0])
    x = x + _mha(n0, n0, tbias, w_self_ref, b_self_ref, bd_self)

    # ---- Sublayer 1: x + src_attn(LN(x), memory, memory, src_mask) ---------
    n1 = _layer_norm(x, ln_a_ref[1], ln_b_ref[1])
    x = x + _mha(n1, mem, sbias, w_src_ref, b_src_ref, bd_src)

    # ---- Sublayer 2: x + FFN(LN(x)) ; FFN = W2 @ relu(W1 @ x) --------------
    # TODO(synk): sublayer dropout omitted (eval mode -> identity).
    n2 = _layer_norm(x, ln_a_ref[2], ln_b_ref[2])
    h = jnp.dot(n2, w_ff1_ref[...], preferred_element_type=jnp.float32) + b_ff1_ref[...]
    h = jnp.maximum(h, 0.0)
    x = x + jnp.dot(h, w_ff2_ref[...], preferred_element_type=jnp.float32) + b_ff2_ref[...]

    out_ref[0] = x


def _head_block_mask(t_kv):
    # bd[r, d] = 1 iff row r (head r // t_kv) owns lane d (head d // d_k).
    rows = jnp.arange(N_HEADS * t_kv) // t_kv
    cols = jnp.arange(D_MODEL) // D_K
    return (rows[:, None] == cols[None, :]).astype(jnp.float32)


def decoder_layer(x, memory, tgt_mask, src_mask, params):
    B, T, D = x.shape
    S = memory.shape[1]
    scale = 1.0 / math.sqrt(D_K)

    # Fold 1/sqrt(d_k) into the Q projection (one-time, params only).
    w_self = params["w_self"].at[0].multiply(scale)
    b_self = params["b_self"].at[0].multiply(scale)
    w_src = params["w_src"].at[0].multiply(scale)
    b_src = params["b_src"].at[0].multiply(scale)

    bd_self = _head_block_mask(T)      # [H*T, D]
    bd_src = _head_block_mask(S)       # [H*S, D]

    inputs = [
        x, memory, tgt_mask, src_mask,
        w_self, b_self, w_src, b_src,
        params["ln_a"], params["ln_b"],
        params["w_ff1"], params["b_ff1"], params["w_ff2"], params["b_ff2"],
        bd_self, bd_src,
    ]

    def batch_spec(a):
        nd = a.ndim
        return pl.BlockSpec((1,) + a.shape[1:],
                            lambda b, _nd=nd: (b,) + (0,) * (_nd - 1))

    def const_spec(a):
        nd = a.ndim
        return pl.BlockSpec(a.shape, lambda b, _nd=nd: (0,) * _nd)

    in_specs = ([batch_spec(a) for a in inputs[:4]]
                + [const_spec(a) for a in inputs[4:]])

    out = pl.pallas_call(
        _decoder_kernel,
        grid=(B,),
        in_specs=in_specs,
        out_specs=pl.BlockSpec((1, T, D), lambda b: (b, 0, 0)),
        out_shape=jax.ShapeDtypeStruct((B, T, D), jnp.float32),
        compiler_params=pltpu.CompilerParams(
            # Batch steps are independent -> shard across v7x's two TCs.
            dimension_semantics=("parallel",),
            # Explicit scoped-VMEM limit (safe on v5e's 16 MiB default and
            # within v7x's 64 MiB physical budget).
            vmem_limit_bytes=32 * 1024 * 1024),
    )(*inputs)
    return out


# ---------------------------------------------------------------------------
# Pure-JAX reference for verification (f32, where-based masking)
# ---------------------------------------------------------------------------
def _ref_single(x, m, tmask, smask, params):
    def ln(v, a, b):
        mean = jnp.mean(v, axis=-1, keepdims=True)
        var = jnp.sum((v - mean) ** 2, axis=-1, keepdims=True) / (v.shape[-1] - 1)
        return a * (v - mean) / (jnp.sqrt(var) + EPS) + b

    def mha(q_in, k_in, v_in, mask, w, b):
        q = q_in @ w[0] + b[0]
        k = k_in @ w[1] + b[1]
        v = v_in @ w[2] + b[2]
        Tq, Tk = q.shape[0], k.shape[0]
        qh = q.reshape(Tq, N_HEADS, D_K).transpose(1, 0, 2)
        kh = k.reshape(Tk, N_HEADS, D_K).transpose(1, 0, 2)
        vh = v.reshape(Tk, N_HEADS, D_K).transpose(1, 0, 2)
        scores = jnp.einsum("htd,hsd->hts", qh, kh) / jnp.sqrt(jnp.float32(D_K))
        scores = jnp.where(mask[None] > 0.5, scores, -1e9)
        p = jax.nn.softmax(scores, axis=-1)
        ctx = jnp.einsum("hts,hsd->htd", p, vh)
        ctx = ctx.transpose(1, 0, 2).reshape(Tq, D_MODEL)
        return ctx @ w[3] + b[3]

    ln_a, ln_b = params["ln_a"], params["ln_b"]
    n0 = ln(x, ln_a[0], ln_b[0])
    x = x + mha(n0, n0, n0, tmask, params["w_self"], params["b_self"])
    n1 = ln(x, ln_a[1], ln_b[1])
    x = x + mha(n1, m, m, smask, params["w_src"], params["b_src"])
    n2 = ln(x, ln_a[2], ln_b[2])
    h = jnp.maximum(n2 @ params["w_ff1"] + params["b_ff1"], 0.0)
    return x + h @ params["w_ff2"] + params["b_ff2"]


def reference(x, memory, tgt_mask, src_mask, params):
    return jax.vmap(lambda a, b, c, d: _ref_single(a, b, c, d, params))(
        x, memory, tgt_mask, src_mask)


# ---------------------------------------------------------------------------
if __name__ == "__main__":
    B, T, S = 2, 8, 8

    key = jax.random.PRNGKey(0)
    keys = jax.random.split(key, 12)

    def init(k, shape, scale=0.05):
        return (jax.random.normal(k, shape) * scale).astype(jnp.float32)

    params = {
        "w_self": init(keys[0], (4, D_MODEL, D_MODEL)),
        "b_self": init(keys[1], (4, 1, D_MODEL)),
        "w_src":  init(keys[2], (4, D_MODEL, D_MODEL)),
        "b_src":  init(keys[3], (4, 1, D_MODEL)),
        "ln_a":   jnp.ones((3, 1, D_MODEL), jnp.float32),
        "ln_b":   jnp.zeros((3, 1, D_MODEL), jnp.float32),
        "w_ff1":  init(keys[4], (D_MODEL, D_FF)),
        "b_ff1":  init(keys[5], (1, D_FF)),
        "w_ff2":  init(keys[6], (D_FF, D_MODEL)),
        "b_ff2":  init(keys[7], (1, D_MODEL)),
    }

    x = jax.random.normal(keys[8], (B, T, D_MODEL), dtype=jnp.float32)
    memory = jax.random.normal(keys[9], (B, S, D_MODEL), dtype=jnp.float32)

    # Causal target mask [B, T, T]; source mask [B, T, S] with the last two
    # memory positions of batch 1 padded out.
    tgt_mask = jnp.broadcast_to(
        jnp.tril(jnp.ones((T, T), jnp.float32)), (B, T, T))
    src_valid = jnp.stack([jnp.ones((S,), jnp.float32),
                           jnp.concatenate([jnp.ones((S - 2,), jnp.float32),
                                            jnp.zeros((2,), jnp.float32)])])
    src_mask = jnp.broadcast_to(src_valid[:, None, :], (B, T, S))

    out = decoder_layer(x, memory, tgt_mask, src_mask, params)
    out = jax.block_until_ready(out)

    ref = jax.block_until_ready(reference(x, memory, tgt_mask, src_mask, params))
    assert out.shape == (B, T, D_MODEL)
    assert jnp.allclose(out, ref, atol=1e-3, rtol=1e-3), (
        f"max abs err {jnp.max(jnp.abs(out - ref))}")

    print("KERNEL_OK")
</pallas_src>

<mosaic_0001>
module attributes {stable_mosaic.version = 11 : i64} {
  func.func @_decoder_kernel(%arg0: i32, %arg1: memref<1x8x32xf32, #tpu.memory_space<vmem>>, %arg2: memref<1x8x32xf32, #tpu.memory_space<vmem>>, %arg3: memref<1x8x8xf32, #tpu.memory_space<vmem>>, %arg4: memref<1x8x8xf32, #tpu.memory_space<vmem>>, %arg5: memref<4x32x32xf32, #tpu.memory_space<vmem>>, %arg6: memref<4x1x32xf32, #tpu.memory_space<vmem>>, %arg7: memref<4x32x32xf32, #tpu.memory_space<vmem>>, %arg8: memref<4x1x32xf32, #tpu.memory_space<vmem>>, %arg9: memref<3x1x32xf32, #tpu.memory_space<vmem>>, %arg10: memref<3x1x32xf32, #tpu.memory_space<vmem>>, %arg11: memref<32x64xf32, #tpu.memory_space<vmem>>, %arg12: memref<1x64xf32, #tpu.memory_space<vmem>>, %arg13: memref<64x32xf32, #tpu.memory_space<vmem>>, %arg14: memref<1x32xf32, #tpu.memory_space<vmem>>, %arg15: memref<32x32xf32, #tpu.memory_space<vmem>>, %arg16: memref<32x32xf32, #tpu.memory_space<vmem>>, %arg17: memref<1x8x32xf32, #tpu.memory_space<vmem>>) attributes {dimension_semantics = [#tpu.dimension_semantics<parallel>], iteration_bounds = array<i64: 2>, scalar_prefetch = 0 : i64, scratch_operands = 0 : i64, tpu.core_type = #tpu.core_type<tc>, window_params = [{transform_indices = @transform_0, window_bounds = array<i64: 1, 8, 32>}, {transform_indices = @transform_1, window_bounds = array<i64: 1, 8, 32>}, {transform_indices = @transform_2, window_bounds = array<i64: 1, 8, 8>}, {transform_indices = @transform_3, window_bounds = array<i64: 1, 8, 8>}, {pipeline_mode = #tpu.pipeline_mode<synchronous>, transform_indices = @transform_4, window_bounds = array<i64: 4, 32, 32>}, {pipeline_mode = #tpu.pipeline_mode<synchronous>, transform_indices = @transform_5, window_bounds = array<i64: 4, 1, 32>}, {pipeline_mode = #tpu.pipeline_mode<synchronous>, transform_indices = @transform_6, window_bounds = array<i64: 4, 32, 32>}, {pipeline_mode = #tpu.pipeline_mode<synchronous>, transform_indices = @transform_7, window_bounds = array<i64: 4, 1, 32>}, {pipeline_mode = #tpu.pipeline_mode<synchronous>, transform_indices = @transform_8, window_bounds = array<i64: 3, 1, 32>}, {pipeline_mode = #tpu.pipeline_mode<synchronous>, transform_indices = @transform_9, window_bounds = array<i64: 3, 1, 32>}, {pipeline_mode = #tpu.pipeline_mode<synchronous>, transform_indices = @transform_10, window_bounds = array<i64: 32, 64>}, {pipeline_mode = #tpu.pipeline_mode<synchronous>, transform_indices = @transform_11, window_bounds = array<i64: 1, 64>}, {pipeline_mode = #tpu.pipeline_mode<synchronous>, transform_indices = @transform_12, window_bounds = array<i64: 64, 32>}, {pipeline_mode = #tpu.pipeline_mode<synchronous>, transform_indices = @transform_13, window_bounds = array<i64: 1, 32>}, {pipeline_mode = #tpu.pipeline_mode<synchronous>, transform_indices = @transform_14, window_bounds = array<i64: 32, 32>}, {pipeline_mode = #tpu.pipeline_mode<synchronous>, transform_indices = @transform_15, window_bounds = array<i64: 32, 32>}, {transform_indices = @transform_16, window_bounds = array<i64: 1, 8, 32>}]} {
    %c0 = arith.constant 0 : index
    %c0_0 = arith.constant 0 : index
    %c0_1 = arith.constant 0 : index
    %0 = vector.load %arg1[%c0, %c0_0, %c0_1] : memref<1x8x32xf32, #tpu.memory_space<vmem>>, vector<1x8x32xf32>
    %1 = vector.shape_cast %0 : vector<1x8x32xf32> to vector<8x32xf32>
    %c0_2 = arith.constant 0 : index
    %c0_3 = arith.constant 0 : index
    %c0_4 = arith.constant 0 : index
    %2 = vector.load %arg2[%c0_2, %c0_3, %c0_4] : memref<1x8x32xf32, #tpu.memory_space<vmem>>, vector<1x8x32xf32>
    %3 = vector.shape_cast %2 : vector<1x8x32xf32> to vector<8x32xf32>
    %c0_5 = arith.constant 0 : index
    %c0_6 = arith.constant 0 : index
    %c0_7 = arith.constant 0 : index
    %4 = vector.load %arg3[%c0_5, %c0_6, %c0_7] : memref<1x8x8xf32, #tpu.memory_space<vmem>>, vector<1x8x8xf32>
    %5 = vector.shape_cast %4 : vector<1x8x8xf32> to vector<8x8xf32>
    %cst = arith.constant 1.000000e+00 : f32
    %6 = vector.broadcast %cst : f32 to vector<8x8xf32>
    %7 = arith.subf %5, %6 : vector<8x8xf32>
    %cst_8 = arith.constant 1.000000e+09 : f32
    %8 = vector.broadcast %cst_8 : f32 to vector<8x8xf32>
    %9 = arith.mulf %7, %8 : vector<8x8xf32>
    %c0_9 = arith.constant 0 : index
    %c0_10 = arith.constant 0 : index
    %c0_11 = arith.constant 0 : index
    %10 = vector.load %arg4[%c0_9, %c0_10, %c0_11] : memref<1x8x8xf32, #tpu.memory_space<vmem>>, vector<1x8x8xf32>
    %11 = vector.shape_cast %10 : vector<1x8x8xf32> to vector<8x8xf32>
    %cst_12 = arith.constant 1.000000e+00 : f32
    %12 = vector.broadcast %cst_12 : f32 to vector<8x8xf32>
    %13 = arith.subf %11, %12 : vector<8x8xf32>
    %cst_13 = arith.constant 1.000000e+09 : f32
    %14 = vector.broadcast %cst_13 : f32 to vector<8x8xf32>
    %15 = arith.mulf %13, %14 : vector<8x8xf32>
    %c0_14 = arith.constant 0 : index
    %c0_15 = arith.constant 0 : index
    %16 = vector.load %arg15[%c0_14, %c0_15] : memref<32x32xf32, #tpu.memory_space<vmem>>, vector<32x32xf32>
    %c0_16 = arith.constant 0 : index
    %c0_17 = arith.constant 0 : index
    %17 = vector.load %arg16[%c0_16, %c0_17] : memref<32x32xf32, #tpu.memory_space<vmem>>, vector<32x32xf32>
    %c0_18 = arith.constant 0 : index
    %c0_19 = arith.constant 0 : index
    %c0_20 = arith.constant 0 : index
    %18 = vector.load %arg9[%c0_18, %c0_19, %c0_20] : memref<3x1x32xf32, #tpu.memory_space<vmem>>, vector<1x1x32xf32>
    %19 = vector.shape_cast %18 : vector<1x1x32xf32> to vector<1x32xf32>
    %c0_21 = arith.constant 0 : index
    %c0_22 = arith.constant 0 : index
    %c0_23 = arith.constant 0 : index
    %20 = vector.load %arg10[%c0_21, %c0_22, %c0_23] : memref<3x1x32xf32, #tpu.memory_space<vmem>>, vector<1x1x32xf32>
    %21 = vector.shape_cast %20 : vector<1x1x32xf32> to vector<1x32xf32>
    %cst_24 = arith.constant dense<0.000000e+00> : vector<8xf32>
    %22 = vector.multi_reduction <add>, %1, %cst_24 [1] : vector<8x32xf32> to vector<8xf32>
    %23 = vector.shape_cast %22 : vector<8xf32> to vector<8x1xf32>
    %cst_25 = arith.constant 3.200000e+01 : f32
    %24 = vector.broadcast %cst_25 : f32 to vector<8x1xf32>
    %25 = arith.divf %23, %24 : vector<8x1xf32>
    %26 = vector.broadcast %25 : vector<8x1xf32> to vector<8x32xf32>
    %27 = arith.subf %1, %26 : vector<8x32xf32>
    %28 = arith.mulf %27, %27 : vector<8x32xf32>
    %cst_26 = arith.constant dense<0.000000e+00> : vector<8xf32>
    %29 = vector.multi_reduction <add>, %28, %cst_26 [1] : vector<8x32xf32> to vector<8xf32>
    %30 = vector.shape_cast %29 : vector<8xf32> to vector<8x1xf32>
    %cst_27 = arith.constant 0.0322580636 : f32
    %31 = vector.broadcast %cst_27 : f32 to vector<8x1xf32>
    %32 = arith.mulf %30, %31 : vector<8x1xf32>
    %33 = vector.broadcast %19 : vector<1x32xf32> to vector<8x32xf32>
    %34 = arith.mulf %33, %27 : vector<8x32xf32>
    %35 = math.sqrt %32 : vector<8x1xf32>
    %cst_28 = arith.constant 9.99999997E-7 : f32
    %36 = vector.broadcast %cst_28 : f32 to vector<8x1xf32>
    %37 = arith.addf %35, %36 : vector<8x1xf32>
    %38 = vector.broadcast %37 : vector<8x1xf32> to vector<8x32xf32>
    %39 = arith.divf %34, %38 : vector<8x32xf32>
    %40 = vector.broadcast %21 : vector<1x32xf32> to vector<8x32xf32>
    %41 = arith.addf %39, %40 : vector<8x32xf32>
    %c0_29 = arith.constant 0 : index
    %c0_30 = arith.constant 0 : index
    %c0_31 = arith.constant 0 : index
    %42 = vector.load %arg5[%c0_29, %c0_30, %c0_31] : memref<4x32x32xf32, #tpu.memory_space<vmem>>, vector<1x32x32xf32>
    %43 = vector.shape_cast %42 : vector<1x32x32xf32> to vector<32x32xf32>
    %cst_32 = arith.constant dense<0.000000e+00> : vector<8x32xf32>
    %44 = tpu.matmul %41, %43, %cst_32 {dimension_numbers = #tpu.dot_dimension_numbers<[1], [0], [0], [1], [0, 0, 1, 1], [], []>} : vector<8x32xf32>, vector<32x32xf32>, vector<8x32xf32> -> vector<8x32xf32>
    %c0_33 = arith.constant 0 : index
    %c0_34 = arith.constant 0 : index
    %c0_35 = arith.constant 0 : index
    %45 = vector.load %arg6[%c0_33, %c0_34, %c0_35] : memref<4x1x32xf32, #tpu.memory_space<vmem>>, vector<1x1x32xf32>
    %46 = vector.shape_cast %45 : vector<1x1x32xf32> to vector<1x32xf32>
    %47 = vector.broadcast %46 : vector<1x32xf32> to vector<8x32xf32>
    %48 = arith.addf %44, %47 : vector<8x32xf32>
    %c1 = arith.constant 1 : index
    %c0_36 = arith.constant 0 : index
    %c0_37 = arith.constant 0 : index
    %49 = vector.load %arg5[%c1, %c0_36, %c0_37] : memref<4x32x32xf32, #tpu.memory_space<vmem>>, vector<1x32x32xf32>
    %50 = vector.shape_cast %49 : vector<1x32x32xf32> to vector<32x32xf32>
    %cst_38 = arith.constant dense<0.000000e+00> : vector<8x32xf32>
    %51 = tpu.matmul %41, %50, %cst_38 {dimension_numbers = #tpu.dot_dimension_numbers<[1], [0], [0], [1], [0, 0, 1, 1], [], []>} : vector<8x32xf32>, vector<32x32xf32>, vector<8x32xf32> -> vector<8x32xf32>
    %c1_39 = arith.constant 1 : index
    %c0_40 = arith.constant 0 : index
    %c0_41 = arith.constant 0 : index
    %52 = vector.load %arg6[%c1_39, %c0_40, %c0_41] : memref<4x1x32xf32, #tpu.memory_space<vmem>>, vector<1x1x32xf32>
    %53 = vector.shape_cast %52 : vector<1x1x32xf32> to vector<1x32xf32>
    %54 = vector.broadcast %53 : vector<1x32xf32> to vector<8x32xf32>
    %55 = arith.addf %51, %54 : vector<8x32xf32>
    %c2 = arith.constant 2 : index
    %c0_42 = arith.constant 0 : index
    %c0_43 = arith.constant 0 : index
    %56 = vector.load %arg5[%c2, %c0_42, %c0_43] : memref<4x32x32xf32, #tpu.memory_space<vmem>>, vector<1x32x32xf32>
    %57 = vector.shape_cast %56 : vector<1x32x32xf32> to vector<32x32xf32>
    %cst_44 = arith.constant dense<0.000000e+00> : vector<8x32xf32>
    %58 = tpu.matmul %41, %57, %cst_44 {dimension_numbers = #tpu.dot_dimension_numbers<[1], [0], [0], [1], [0, 0, 1, 1], [], []>} : vector<8x32xf32>, vector<32x32xf32>, vector<8x32xf32> -> vector<8x32xf32>
    %c2_45 = arith.constant 2 : index
    %c0_46 = arith.constant 0 : index
    %c0_47 = arith.constant 0 : index
    %59 = vector.load %arg6[%c2_45, %c0_46, %c0_47] : memref<4x1x32xf32, #tpu.memory_space<vmem>>, vector<1x1x32xf32>
    %60 = vector.shape_cast %59 : vector<1x1x32xf32> to vector<1x32xf32>
    %61 = vector.broadcast %60 : vector<1x32xf32> to vector<8x32xf32>
    %62 = arith.addf %58, %61 : vector<8x32xf32>
    %63 = tpu.concatenate %55, %55, %55, %55 in 0 : vector<8x32xf32>, vector<8x32xf32>, vector<8x32xf32>, vector<8x32xf32> -> vector<32x32xf32>
    %64 = arith.mulf %63, %16 : vector<32x32xf32>
    %65 = tpu.concatenate %62, %62, %62, %62 in 0 : vector<8x32xf32>, vector<8x32xf32>, vector<8x32xf32>, vector<8x32xf32> -> vector<32x32xf32>
    %66 = arith.mulf %65, %16 : vector<32x32xf32>
    %cst_48 = arith.constant dense<0.000000e+00> : vector<8x32xf32>
    %67 = tpu.matmul %48, %64, %cst_48 {dimension_numbers = #tpu.dot_dimension_numbers<[1], [1], [0], [0], [0, 0, 1, 0], [], []>} : vector<8x32xf32>, vector<32x32xf32>, vector<8x32xf32> -> vector<8x32xf32>
    %68 = tpu.concatenate %9, %9, %9, %9 in 1 : vector<8x8xf32>, vector<8x8xf32>, vector<8x8xf32>, vector<8x8xf32> -> vector<8x32xf32>
    %69 = arith.addf %67, %68 : vector<8x32xf32>
    %cst_49 = arith.constant dense<0xFF800000> : vector<8xf32>
    %70 = vector.multi_reduction <maximumf>, %69, %cst_49 [1] : vector<8x32xf32> to vector<8xf32>
    %71 = vector.shape_cast %70 : vector<8xf32> to vector<8x1xf32>
    %72 = vector.broadcast %71 : vector<8x1xf32> to vector<8x32xf32>
    %73 = arith.subf %69, %72 : vector<8x32xf32>
    %74 = math.exp %73 : vector<8x32xf32>
    %cst_50 = arith.constant dense<0.000000e+00> : vector<8x32xf32>
    %75 = tpu.matmul %74, %66, %cst_50 {dimension_numbers = #tpu.dot_dimension_numbers<[1], [0], [0], [1], [0, 0, 1, 1], [], []>} : vector<8x32xf32>, vector<32x32xf32>, vector<8x32xf32> -> vector<8x32xf32>
    %cst_51 = arith.constant dense<0.000000e+00> : vector<8x32xf32>
    %76 = tpu.matmul %74, %16, %cst_51 {dimension_numbers = #tpu.dot_dimension_numbers<[1], [0], [0], [1], [0, 0, 1, 1], [], []>} : vector<8x32xf32>, vector<32x32xf32>, vector<8x32xf32> -> vector<8x32xf32>
    %77 = tpu.reciprocal %76 {approx = true} : vector<8x32xf32> -> vector<8x32xf32>
    %78 = arith.mulf %75, %77 : vector<8x32xf32>
    %c3 = arith.constant 3 : index
    %c0_52 = arith.constant 0 : index
    %c0_53 = arith.constant 0 : index
    %79 = vector.load %arg5[%c3, %c0_52, %c0_53] : memref<4x32x32xf32, #tpu.memory_space<vmem>>, vector<1x32x32xf32>
    %80 = vector.shape_cast %79 : vector<1x32x32xf32> to vector<32x32xf32>
    %cst_54 = arith.constant dense<0.000000e+00> : vector<8x32xf32>
    %81 = tpu.matmul %78, %80, %cst_54 {dimension_numbers = #tpu.dot_dimension_numbers<[1], [0], [0], [1], [0, 0, 1, 1], [], []>} : vector<8x32xf32>, vector<32x32xf32>, vector<8x32xf32> -> vector<8x32xf32>
    %c3_55 = arith.constant 3 : index
    %c0_56 = arith.constant 0 : index
    %c0_57 = arith.constant 0 : index
    %82 = vector.load %arg6[%c3_55, %c0_56, %c0_57] : memref<4x1x32xf32, #tpu.memory_space<vmem>>, vector<1x1x32xf32>
    %83 = vector.shape_cast %82 : vector<1x1x32xf32> to vector<1x32xf32>
    %84 = vector.broadcast %83 : vector<1x32xf32> to vector<8x32xf32>
    %85 = arith.addf %81, %84 : vector<8x32xf32>
    %86 = arith.addf %1, %85 : vector<8x32xf32>
    %c1_58 = arith.constant 1 : index
    %c0_59 = arith.constant 0 : index
    %c0_60 = arith.constant 0 : index
    %87 = vector.load %arg9[%c1_58, %c0_59, %c0_60] : memref<3x1x32xf32, #tpu.memory_space<vmem>>, vector<1x1x32xf32>
    %88 = vector.shape_cast %87 : vector<1x1x32xf32> to vector<1x32xf32>
    %c1_61 = arith.constant 1 : index
    %c0_62 = arith.constant 0 : index
    %c0_63 = arith.constant 0 : index
    %89 = vector.load %arg10[%c1_61, %c0_62, %c0_63] : memref<3x1x32xf32, #tpu.memory_space<vmem>>, vector<1x1x32xf32>
    %90 = vector.shape_cast %89 : vector<1x1x32xf32> to vector<1x32xf32>
    %cst_64 = arith.constant dense<0.000000e+00> : vector<8xf32>
    %91 = vector.multi_reduction <add>, %86, %cst_64 [1] : vector<8x32xf32> to vector<8xf32>
    %92 = vector.shape_cast %91 : vector<8xf32> to vector<8x1xf32>
    %cst_65 = arith.constant 3.200000e+01 : f32
    %93 = vector.broadcast %cst_65 : f32 to vector<8x1xf32>
    %94 = arith.divf %92, %93 : vector<8x1xf32>
    %95 = vector.broadcast %94 : vector<8x1xf32> to vector<8x32xf32>
    %96 = arith.subf %86, %95 : vector<8x32xf32>
    %97 = arith.mulf %96, %96 : vector<8x32xf32>
    %cst_66 = arith.constant dense<0.000000e+00> : vector<8xf32>
    %98 = vector.multi_reduction <add>, %97, %cst_66 [1] : vector<8x32xf32> to vector<8xf32>
    %99 = vector.shape_cast %98 : vector<8xf32> to vector<8x1xf32>
    %cst_67 = arith.constant 0.0322580636 : f32
    %100 = vector.broadcast %cst_67 : f32 to vector<8x1xf32>
    %101 = arith.mulf %99, %100 : vector<8x1xf32>
    %102 = vector.broadcast %88 : vector<1x32xf32> to vector<8x32xf32>
    %103 = arith.mulf %102, %96 : vector<8x32xf32>
    %104 = math.sqrt %101 : vector<8x1xf32>
    %cst_68 = arith.constant 9.99999997E-7 : f32
    %105 = vector.broadcast %cst_68 : f32 to vector<8x1xf32>
    %106 = arith.addf %104, %105 : vector<8x1xf32>
    %107 = vector.broadcast %106 : vector<8x1xf32> to vector<8x32xf32>
    %108 = arith.divf %103, %107 : vector<8x32xf32>
    %109 = vector.broadcast %90 : vector<1x32xf32> to vector<8x32xf32>
    %110 = arith.addf %108, %109 : vector<8x32xf32>
    %c0_69 = arith.constant 0 : index
    %c0_70 = arith.constant 0 : index
    %c0_71 = arith.constant 0 : index
    %111 = vector.load %arg7[%c0_69, %c0_70, %c0_71] : memref<4x32x32xf32, #tpu.memory_space<vmem>>, vector<1x32x32xf32>
    %112 = vector.shape_cast %111 : vector<1x32x32xf32> to vector<32x32xf32>
    %cst_72 = arith.constant dense<0.000000e+00> : vector<8x32xf32>
    %113 = tpu.matmul %110, %112, %cst_72 {dimension_numbers = #tpu.dot_dimension_numbers<[1], [0], [0], [1], [0, 0, 1, 1], [], []>} : vector<8x32xf32>, vector<32x32xf32>, vector<8x32xf32> -> vector<8x32xf32>
    %c0_73 = arith.constant 0 : index
    %c0_74 = arith.constant 0 : index
    %c0_75 = arith.constant 0 : index
    %114 = vector.load %arg8[%c0_73, %c0_74, %c0_75] : memref<4x1x32xf32, #tpu.memory_space<vmem>>, vector<1x1x32xf32>
    %115 = vector.shape_cast %114 : vector<1x1x32xf32> to vector<1x32xf32>
    %116 = vector.broadcast %115 : vector<1x32xf32> to vector<8x32xf32>
    %117 = arith.addf %113, %116 : vector<8x32xf32>
    %c1_76 = arith.constant 1 : index
    %c0_77 = arith.constant 0 : index
    %c0_78 = arith.constant 0 : index
    %118 = vector.load %arg7[%c1_76, %c0_77, %c0_78] : memref<4x32x32xf32, #tpu.memory_space<vmem>>, vector<1x32x32xf32>
    %119 = vector.shape_cast %118 : vector<1x32x32xf32> to vector<32x32xf32>
    %cst_79 = arith.constant dense<0.000000e+00> : vector<8x32xf32>
    %120 = tpu.matmul %3, %119, %cst_79 {dimension_numbers = #tpu.dot_dimension_numbers<[1], [0], [0], [1], [0, 0, 1, 1], [], []>} : vector<8x32xf32>, vector<32x32xf32>, vector<8x32xf32> -> vector<8x32xf32>
    %c1_80 = arith.constant 1 : index
    %c0_81 = arith.constant 0 : index
    %c0_82 = arith.constant 0 : index
    %121 = vector.load %arg8[%c1_80, %c0_81, %c0_82] : memref<4x1x32xf32, #tpu.memory_space<vmem>>, vector<1x1x32xf32>
    %122 = vector.shape_cast %121 : vector<1x1x32xf32> to vector<1x32xf32>
    %123 = vector.broadcast %122 : vector<1x32xf32> to vector<8x32xf32>
    %124 = arith.addf %120, %123 : vector<8x32xf32>
    %c2_83 = arith.constant 2 : index
    %c0_84 = arith.constant 0 : index
    %c0_85 = arith.constant 0 : index
    %125 = vector.load %arg7[%c2_83, %c0_84, %c0_85] : memref<4x32x32xf32, #tpu.memory_space<vmem>>, vector<1x32x32xf32>
    %126 = vector.shape_cast %125 : vector<1x32x32xf32> to vector<32x32xf32>
    %cst_86 = arith.constant dense<0.000000e+00> : vector<8x32xf32>
    %127 = tpu.matmul %3, %126, %cst_86 {dimension_numbers = #tpu.dot_dimension_numbers<[1], [0], [0], [1], [0, 0, 1, 1], [], []>} : vector<8x32xf32>, vector<32x32xf32>, vector<8x32xf32> -> vector<8x32xf32>
    %c2_87 = arith.constant 2 : index
    %c0_88 = arith.constant 0 : index
    %c0_89 = arith.constant 0 : index
    %128 = vector.load %arg8[%c2_87, %c0_88, %c0_89] : memref<4x1x32xf32, #tpu.memory_space<vmem>>, vector<1x1x32xf32>
    %129 = vector.shape_cast %128 : vector<1x1x32xf32> to vector<1x32xf32>
    %130 = vector.broadcast %129 : vector<1x32xf32> to vector<8x32xf32>
    %131 = arith.addf %127, %130 : vector<8x32xf32>
    %132 = tpu.concatenate %124, %124, %124, %124 in 0 : vector<8x32xf32>, vector<8x32xf32>, vector<8x32xf32>, vector<8x32xf32> -> vector<32x32xf32>
    %133 = arith.mulf %132, %17 : vector<32x32xf32>
    %134 = tpu.concatenate %131, %131, %131, %131 in 0 : vector<8x32xf32>, vector<8x32xf32>, vector<8x32xf32>, vector<8x32xf32> -> vector<32x32xf32>
    %135 = arith.mulf %134, %17 : vector<32x32xf32>
    %cst_90 = arith.constant dense<0.000000e+00> : vector<8x32xf32>
    %136 = tpu.matmul %117, %133, %cst_90 {dimension_numbers = #tpu.dot_dimension_numbers<[1], [1], [0], [0], [0, 0, 1, 0], [], []>} : vector<8x32xf32>, vector<32x32xf32>, vector<8x32xf32> -> vector<8x32xf32>
    %137 = tpu.concatenate %15, %15, %15, %15 in 1 : vector<8x8xf32>, vector<8x8xf32>, vector<8x8xf32>, vector<8x8xf32> -> vector<8x32xf32>
    %138 = arith.addf %136, %137 : vector<8x32xf32>
    %cst_91 = arith.constant dense<0xFF800000> : vector<8xf32>
    %139 = vector.multi_reduction <maximumf>, %138, %cst_91 [1] : vector<8x32xf32> to vector<8xf32>
    %140 = vector.shape_cast %139 : vector<8xf32> to vector<8x1xf32>
    %141 = vector.broadcast %140 : vector<8x1xf32> to vector<8x32xf32>
    %142 = arith.subf %138, %141 : vector<8x32xf32>
    %143 = math.exp %142 : vector<8x32xf32>
    %cst_92 = arith.constant dense<0.000000e+00> : vector<8x32xf32>
    %144 = tpu.matmul %143, %135, %cst_92 {dimension_numbers = #tpu.dot_dimension_numbers<[1], [0], [0], [1], [0, 0, 1, 1], [], []>} : vector<8x32xf32>, vector<32x32xf32>, vector<8x32xf32> -> vector<8x32xf32>
    %cst_93 = arith.constant dense<0.000000e+00> : vector<8x32xf32>
    %145 = tpu.matmul %143, %17, %cst_93 {dimension_numbers = #tpu.dot_dimension_numbers<[1], [0], [0], [1], [0, 0, 1, 1], [], []>} : vector<8x32xf32>, vector<32x32xf32>, vector<8x32xf32> -> vector<8x32xf32>
    %146 = tpu.reciprocal %145 {approx = true} : vector<8x32xf32> -> vector<8x32xf32>
    %147 = arith.mulf %144, %146 : vector<8x32xf32>
    %c3_94 = arith.constant 3 : index
    %c0_95 = arith.constant 0 : index
    %c0_96 = arith.constant 0 : index
    %148 = vector.load %arg7[%c3_94, %c0_95, %c0_96] : memref<4x32x32xf32, #tpu.memory_space<vmem>>, vector<1x32x32xf32>
    %149 = vector.shape_cast %148 : vector<1x32x32xf32> to vector<32x32xf32>
    %cst_97 = arith.constant dense<0.000000e+00> : vector<8x32xf32>
    %150 = tpu.matmul %147, %149, %cst_97 {dimension_numbers = #tpu.dot_dimension_numbers<[1], [0], [0], [1], [0, 0, 1, 1], [], []>} : vector<8x32xf32>, vector<32x32xf32>, vector<8x32xf32> -> vector<8x32xf32>
    %c3_98 = arith.constant 3 : index
    %c0_99 = arith.constant 0 : index
    %c0_100 = arith.constant 0 : index
    %151 = vector.load %arg8[%c3_98, %c0_99, %c0_100] : memref<4x1x32xf32, #tpu.memory_space<vmem>>, vector<1x1x32xf32>
    %152 = vector.shape_cast %151 : vector<1x1x32xf32> to vector<1x32xf32>
    %153 = vector.broadcast %152 : vector<1x32xf32> to vector<8x32xf32>
    %154 = arith.addf %150, %153 : vector<8x32xf32>
    %155 = arith.addf %86, %154 : vector<8x32xf32>
    %c2_101 = arith.constant 2 : index
    %c0_102 = arith.constant 0 : index
    %c0_103 = arith.constant 0 : index
    %156 = vector.load %arg9[%c2_101, %c0_102, %c0_103] : memref<3x1x32xf32, #tpu.memory_space<vmem>>, vector<1x1x32xf32>
    %157 = vector.shape_cast %156 : vector<1x1x32xf32> to vector<1x32xf32>
    %c2_104 = arith.constant 2 : index
    %c0_105 = arith.constant 0 : index
    %c0_106 = arith.constant 0 : index
    %158 = vector.load %arg10[%c2_104, %c0_105, %c0_106] : memref<3x1x32xf32, #tpu.memory_space<vmem>>, vector<1x1x32xf32>
    %159 = vector.shape_cast %158 : vector<1x1x32xf32> to vector<1x32xf32>
    %cst_107 = arith.constant dense<0.000000e+00> : vector<8xf32>
    %160 = vector.multi_reduction <add>, %155, %cst_107 [1] : vector<8x32xf32> to vector<8xf32>
    %161 = vector.shape_cast %160 : vector<8xf32> to vector<8x1xf32>
    %cst_108 = arith.constant 3.200000e+01 : f32
    %162 = vector.broadcast %cst_108 : f32 to vector<8x1xf32>
    %163 = arith.divf %161, %162 : vector<8x1xf32>
    %164 = vector.broadcast %163 : vector<8x1xf32> to vector<8x32xf32>
    %165 = arith.subf %155, %164 : vector<8x32xf32>
    %166 = arith.mulf %165, %165 : vector<8x32xf32>
    %cst_109 = arith.constant dense<0.000000e+00> : vector<8xf32>
    %167 = vector.multi_reduction <add>, %166, %cst_109 [1] : vector<8x32xf32> to vector<8xf32>
    %168 = vector.shape_cast %167 : vector<8xf32> to vector<8x1xf32>
    %cst_110 = arith.constant 0.0322580636 : f32
    %169 = vector.broadcast %cst_110 : f32 to vector<8x1xf32>
    %170 = arith.mulf %168, %169 : vector<8x1xf32>
    %171 = vector.broadcast %157 : vector<1x32xf32> to vector<8x32xf32>
    %172 = arith.mulf %171, %165 : vector<8x32xf32>
    %173 = math.sqrt %170 : vector<8x1xf32>
    %cst_111 = arith.constant 9.99999997E-7 : f32
    %174 = vector.broadcast %cst_111 : f32 to vector<8x1xf32>
    %175 = arith.addf %173, %174 : vector<8x1xf32>
    %176 = vector.broadcast %175 : vector<8x1xf32> to vector<8x32xf32>
    %177 = arith.divf %172, %176 : vector<8x32xf32>
    %178 = vector.broadcast %159 : vector<1x32xf32> to vector<8x32xf32>
    %179 = arith.addf %177, %178 : vector<8x32xf32>
    %c0_112 = arith.constant 0 : index
    %c0_113 = arith.constant 0 : index
    %180 = vector.load %arg11[%c0_112, %c0_113] : memref<32x64xf32, #tpu.memory_space<vmem>>, vector<32x64xf32>
    %cst_114 = arith.constant dense<0.000000e+00> : vector<8x64xf32>
    %181 = tpu.matmul %179, %180, %cst_114 {dimension_numbers = #tpu.dot_dimension_numbers<[1], [0], [0], [1], [0, 0, 1, 1], [], []>} : vector<8x32xf32>, vector<32x64xf32>, vector<8x64xf32> -> vector<8x64xf32>
    %c0_115 = arith.constant 0 : index
    %c0_116 = arith.constant 0 : index
    %182 = vector.load %arg12[%c0_115, %c0_116] : memref<1x64xf32, #tpu.memory_space<vmem>>, vector<1x64xf32>
    %183 = vector.broadcast %182 : vector<1x64xf32> to vector<8x64xf32>
    %184 = arith.addf %181, %183 : vector<8x64xf32>
    %cst_117 = arith.constant 0.000000e+00 : f32
    %185 = vector.broadcast %cst_117 : f32 to vector<8x64xf32>
    %186 = arith.maximumf %184, %185 : vector<8x64xf32>
    %c0_118 = arith.constant 0 : index
    %c0_119 = arith.constant 0 : index
    %187 = vector.load %arg13[%c0_118, %c0_119] : memref<64x32xf32, #tpu.memory_space<vmem>>, vector<64x32xf32>
    %cst_120 = arith.constant dense<0.000000e+00> : vector<8x32xf32>
    %188 = tpu.matmul %186, %187, %cst_120 {dimension_numbers = #tpu.dot_dimension_numbers<[1], [0], [0], [1], [0, 0, 1, 1], [], []>} : vector<8x64xf32>, vector<64x32xf32>, vector<8x32xf32> -> vector<8x32xf32>
    %189 = arith.addf %155, %188 : vector<8x32xf32>
    %c0_121 = arith.constant 0 : index
    %c0_122 = arith.constant 0 : index
    %190 = vector.load %arg14[%c0_121, %c0_122] : memref<1x32xf32, #tpu.memory_space<vmem>>, vector<1x32xf32>
    %191 = vector.broadcast %190 : vector<1x32xf32> to vector<8x32xf32>
    %192 = arith.addf %189, %191 : vector<8x32xf32>
    %c0_123 = arith.constant 0 : index
    %c0_124 = arith.constant 0 : index
    %c0_125 = arith.constant 0 : index
    %193 = vector.load %arg17[%c0_123, %c0_124, %c0_125] : memref<1x8x32xf32, #tpu.memory_space<vmem>>, vector<1x8x32xf32>
    %194 = vector.shape_cast %193 : vector<1x8x32xf32> to vector<8x32xf32>
    %195 = vector.shape_cast %192 : vector<8x32xf32> to vector<1x8x32xf32>
    tpu.vector_store %arg17[%c0_123, %c0_124, %c0_125], %195 {strides = array<i32>} : memref<1x8x32xf32, #tpu.memory_space<vmem>>, vector<1x8x32xf32>,
    return
  }
  func.func @transform_0(%arg0: i32) -> (i32, i32, i32) {
    %c0_i32 = arith.constant 0 : i32
    %c0_i32_0 = arith.constant 0 : i32
    %c0_i32_1 = arith.constant 0 : i32
    return %arg0, %c0_i32, %c0_i32_0 : i32, i32, i32
  }
  func.func @transform_1(%arg0: i32) -> (i32, i32, i32) {
    %c0_i32 = arith.constant 0 : i32
    %c0_i32_0 = arith.constant 0 : i32
    %c0_i32_1 = arith.constant 0 : i32
    return %arg0, %c0_i32, %c0_i32_0 : i32, i32, i32
  }
  func.func @transform_2(%arg0: i32) -> (i32, i32, i32) {
    %c0_i32 = arith.constant 0 : i32
    %c0_i32_0 = arith.constant 0 : i32
    %c0_i32_1 = arith.constant 0 : i32
    return %arg0, %c0_i32, %c0_i32_0 : i32, i32, i32
  }
  func.func @transform_3(%arg0: i32) -> (i32, i32, i32) {
    %c0_i32 = arith.constant 0 : i32
    %c0_i32_0 = arith.constant 0 : i32
    %c0_i32_1 = arith.constant 0 : i32
    return %arg0, %c0_i32, %c0_i32_0 : i32, i32, i32
  }
  func.func @transform_4(%arg0: i32) -> (i32, i32, i32) {
    %c0_i32 = arith.constant 0 : i32
    %c0_i32_0 = arith.constant 0 : i32
    %c0_i32_1 = arith.constant 0 : i32
    %c0_i32_2 = arith.constant 0 : i32
    return %c0_i32, %c0_i32_0, %c0_i32_1 : i32, i32, i32
  }
  func.func @transform_5(%arg0: i32) -> (i32, i32, i32) {
    %c0_i32 = arith.constant 0 : i32
    %c0_i32_0 = arith.constant 0 : i32
    %c0_i32_1 = arith.constant 0 : i32
    %c0_i32_2 = arith.constant 0 : i32
    return %c0_i32, %c0_i32_0, %c0_i32_1 : i32, i32, i32
  }
  func.func @transform_6(%arg0: i32) -> (i32, i32, i32) {
    %c0_i32 = arith.constant 0 : i32
    %c0_i32_0 = arith.constant 0 : i32
    %c0_i32_1 = arith.constant 0 : i32
    %c0_i32_2 = arith.constant 0 : i32
    return %c0_i32, %c0_i32_0, %c0_i32_1 : i32, i32, i32
  }
  func.func @transform_7(%arg0: i32) -> (i32, i32, i32) {
    %c0_i32 = arith.constant 0 : i32
    %c0_i32_0 = arith.constant 0 : i32
    %c0_i32_1 = arith.constant 0 : i32
    %c0_i32_2 = arith.constant 0 : i32
    return %c0_i32, %c0_i32_0, %c0_i32_1 : i32, i32, i32
  }
  func.func @transform_8(%arg0: i32) -> (i32, i32, i32) {
    %c0_i32 = arith.constant 0 : i32
    %c0_i32_0 = arith.constant 0 : i32
    %c0_i32_1 = arith.constant 0 : i32
    %c0_i32_2 = arith.constant 0 : i32
    return %c0_i32, %c0_i32_0, %c0_i32_1 : i32, i32, i32
  }
  func.func @transform_9(%arg0: i32) -> (i32, i32, i32) {
    %c0_i32 = arith.constant 0 : i32
    %c0_i32_0 = arith.constant 0 : i32
    %c0_i32_1 = arith.constant 0 : i32
    %c0_i32_2 = arith.constant 0 : i32
    return %c0_i32, %c0_i32_0, %c0_i32_1 : i32, i32, i32
  }
  func.func @transform_10(%arg0: i32) -> (i32, i32) {
    %c0_i32 = arith.constant 0 : i32
    %c0_i32_0 = arith.constant 0 : i32
    %c0_i32_1 = arith.constant 0 : i32
    return %c0_i32, %c0_i32_0 : i32, i32
  }
  func.func @transform_11(%arg0: i32) -> (i32, i32) {
    %c0_i32 = arith.constant 0 : i32
    %c0_i32_0 = arith.constant 0 : i32
    %c0_i32_1 = arith.constant 0 : i32
    return %c0_i32, %c0_i32_0 : i32, i32
  }
  func.func @transform_12(%arg0: i32) -> (i32, i32) {
    %c0_i32 = arith.constant 0 : i32
    %c0_i32_0 = arith.constant 0 : i32
    %c0_i32_1 = arith.constant 0 : i32
    return %c0_i32, %c0_i32_0 : i32, i32
  }
  func.func @transform_13(%arg0: i32) -> (i32, i32) {
    %c0_i32 = arith.constant 0 : i32
    %c0_i32_0 = arith.constant 0 : i32
    %c0_i32_1 = arith.constant 0 : i32
    return %c0_i32, %c0_i32_0 : i32, i32
  }
  func.func @transform_14(%arg0: i32) -> (i32, i32) {
    %c0_i32 = arith.constant 0 : i32
    %c0_i32_0 = arith.constant 0 : i32
    %c0_i32_1 = arith.constant 0 : i32
    return %c0_i32, %c0_i32_0 : i32, i32
  }
  func.func @transform_15(%arg0: i32) -> (i32, i32) {
    %c0_i32 = arith.constant 0 : i32
    %c0_i32_0 = arith.constant 0 : i32
    %c0_i32_1 = arith.constant 0 : i32
    return %c0_i32, %c0_i32_0 : i32, i32
  }
  func.func @transform_16(%arg0: i32) -> (i32, i32, i32) {
    %c0_i32 = arith.constant 0 : i32
    %c0_i32_0 = arith.constant 0 : i32
    %c0_i32_1 = arith.constant 0 : i32
    return %arg0, %c0_i32, %c0_i32_0 : i32, i32, i32
  }
}

</mosaic_0001>

<bundles_post_ra>
// kernel: tpu_custom_call.1
= control target key start
LH: loop header
LB: loop body
LE: loop exit
PB: predicated region body
PF: predicated region fallthrough
CT: control target
= control target key end

     0   :  { %s2681_s0 = inlined_call_operand.hbm [shape: f32[2,8,32], index: 0, kind: input, shape index: {}]   ;;  %s2682_s1 = inlined_call_operand.hbm [shape: f32[2,8,32], index: 1, kind: input, shape index: {}]   ;;  %s2683_s2 = inlined_call_operand.hbm [shape: f32[2,8,8], index: 2, kind: input, shape index: {}]   ;;  %s2684_s3 = inlined_call_operand.hbm [shape: f32[2,8,8], index: 3, kind: input, shape index: {}]   ;;  %s2685_s4 = inlined_call_operand.hbm [shape: f32[4,32,32], index: 4, kind: input, shape index: {}]   ;;  %s2686_s5 = inlined_call_operand.hbm [shape: f32[4,1,32], index: 5, kind: input, shape index: {}]   ;;  %s2687_s6 = inlined_call_operand.hbm [shape: f32[4,32,32], index: 6, kind: input, shape index: {}]   ;;  %s2688_s7 = inlined_call_operand.vmem [shape: f32[4,1,32], index: 7, kind: input, shape index: {}]   ;;  %s2689_s8 = inlined_call_operand.vmem [shape: f32[3,1,32], index: 8, kind: input, shape index: {}]   ;;  %s2690_s9 = inlined_call_operand.hbm [shape: f32[3,1,32], index: 9, kind: input, shape index: {}]   ;;  %s2691_s10 = inlined_call_operand.vmem [shape: f32[32,64], index: 10, kind: input, shape index: {}]   ;;  %s2692_s11 = inlined_call_operand.vmem [shape: f32[1,64], index: 11, kind: input, shape index: {}]   ;;  %s2693_s12 = inlined_call_operand.vmem [shape: f32[64,32], index: 12, kind: input, shape index: {}]   ;;  %s2694_s13 = inlined_call_operand.vmem [shape: f32[1,32], index: 13, kind: input, shape index: {}]   ;;  %s2695_s14 = inlined_call_operand.vmem [shape: f32[32,32], index: 14, kind: input, shape index: {}]   ;;  %s2696_s15 = inlined_call_operand.vmem [shape: f32[32,32], index: 15, kind: input, shape index: {}]   ;;  %s2697_s16 = inlined_call_operand.hbm [shape: f32[2,8,32], index: 16, kind: output, shape index: {}]  }
   0x1   :  { %2718 = sst [smem:[#allocation29_spill]] %s2681_s0 }
   0x2   :  { %2719 = sst [smem:[#allocation30_spill]] %s2682_s1 }
   0x3   :  { %2720 = sst [smem:[#allocation31_spill]] %s2685_s4 }
   0x4   :  { %2721 = sst [smem:[#allocation32_spill]] %s2686_s5 }
   0x5   :  { %2722 = sst [smem:[#allocation33_spill]] %s2687_s6 }
   0x6   :  { %2723 = sst [smem:[#allocation34_spill]] %s2688_s7 }
   0x7   :  { %2724 = sst [smem:[#allocation35_spill]] %s2690_s9 }
   0x8   :  { %2725 = sst [smem:[#allocation36_spill]] %s2691_s10 }
   0x9   :  { %2726 = sst [smem:[#allocation37_spill]] %s2692_s11 }
   0xa   :  { %2727 = sst [smem:[#allocation38_spill]] %s2693_s12 }
   0xb   :  { %2728 = sst [smem:[#allocation39_spill]] %s2694_s13 }
   0xc   :  { %2729 = sst [smem:[#allocation40_spill]] %s2695_s14 }
   0xd   :  { %2730 = sst [smem:[#allocation41_spill]] %s2696_s15 }
   0xe   :  { %2731 = sst [smem:[#allocation42_spill]] %s2697_s16 }
   0xf   :  { %21 = vsyncpa [#allocation3], 0 }
  0x10   :  { %23 = vsyncpa [#allocation3 + $0x1], 0 }
  0x11   :  { %24 = vsyncpa [#allocation6], 0 }
  0x12   :  { %26 = vsyncpa [#allocation6 + $0x1], 0 }
  0x13   :  { %27 = vsyncpa [#allocation9], 0 }
  0x14   :  { %29 = vsyncpa [#allocation9 + $0x1], 0 }
  0x15   :  { %30 = vsyncpa [#allocation12], 0 }
  0x16   :  { %31 = vsyncpa [#allocation15], 0 }
  0x17   :  { %32 = vsyncpa [#allocation4], 0 }
  0x18   :  { %34 = vsyncpa [#allocation4 + $0x1], 0  ;;  %s2255_s21 = smov 0   ;;  %s2257_s22 = smov 0  }
  0x19   :  { %s2259_s23 = smov 0   ;;  %s2261_s24 = smov 0  }
  0x1a LB: > { %2732 = sst [smem:[#allocation24_spill]] %s2144_s21  ;;  %s2276_s25 = sadd.s32 4294967295, %s2156_s24   ;;  %s2156_s24 = sphi %s2261_s24, %s2773_s24   ;;  %s2152_s23 = sphi %s2259_s23, %s2777_s23   ;;  %s2148_s22 = sphi %s2257_s22, %s2776_s22   ;;  %s2144_s21 = sphi %s2255_s21, %s2775_s21  }
  0x1b   : > { %s1622_s26 = sadd.s32 4294967294, %s2156_s24   ;;  %p60_p0 = scmp.ne.s32.totalorder %s2148_s22, %s2144_s21 }
  0x1c   : > { %p2712_p1 = scmp.eq.s32.totalorder %s2276_s25, 0  ;;  %p414_p2 = scmp.eq.s32.totalorder %s2276_s25, 1 }
  0x1d   : > { %p420_p3 = scmp.eq.s32.totalorder %s1622_s26, 1  ;;  %p1623_p5 = scmp.ge.s32.totalorder %s2156_s24, 1 }
  0x1e   : > { %p2285_p4 = por %p2712_p1, %p60_p0  ;;  %p427_p7 = scmp.lt.s32.totalorder %s2156_s24, 3 }
  0x1f   : > { %p2290_p6 = por %p420_p3, %p60_p0  ;;  %s2736_s4 = sld [smem:[#allocation31_spill]] }
  0x20   : > { %p2298_p8 = pnand %p1623_p5, %p427_p7  ;;  %s2158_s18 = smov [#allocation10]  }
  0x21   : > { %s2734_s28 = scalar_select %p2290_p6, 1, 0 }
  0x22   : > { %p1708_p9 = pneg %p2298_p8  ;;  %s440_s19 = sshll.u32 %s2158_s18, 4  ;;  %s441_s19 = int_to_ptr.vmem [resolvable:$true] %s440_s19 }
  0x23   : > { %2735 = sst [smem:[#allocation25_spill]] %s2734_s28  ;;  %s2701_s18 = smov 128  }
  0x24   : > { %p2306_p10 = pnand %p1708_p9, %p2712_p1  ;;  %s2739_s5 = sld [smem:[#allocation32_spill]] }
  0x25   : > { %s438_s0 = sshll.u32 %s2736_s4, 4  ;;  %s2704_s4 = smov 8   ;;  %s439_s0 = int_to_ptr.hbm [resolvable:$true] %s438_s0 }
  0x26   : > { %1711 = dma.hbm_to_vmem [thread:$0]  (!%p2306_p10), %s439_s0, 2048, %s441_s19, [#allocation9], %s2701_s18, %s2701_s18, %s2704_s4  }
  0x27   : > { %s2161_s28 = smov [#allocation11]   ;;  %s2702_s26 = smov 16  }
  0x28   : > { %s454_s21 = sshll.u32 %s2161_s28, 4  ;;  %s2703_s29 = smov 1   ;;  %s455_s21 = int_to_ptr.vmem [resolvable:$true] %s454_s21 }
  0x29   : > { %s47_s0 = sadd.s32 1, %s2152_s23  ;;  %p54_p13 = scmp.ne.s32.totalorder %s2152_s23, %s2148_s22 }
  0x2a   : > { %s452_s30 = sshll.u32 %s2739_s5, 4  ;;  %s2325_s5 = sadd.s32 1, %s2156_s24   ;;  %s453_s30 = int_to_ptr.hbm [resolvable:$true] %s452_s30 }
  0x2b   : > { %1714 = dma.hbm_to_vmem [thread:$0]  (!%p2306_p10), %s453_s30, 64, %s455_s21, [#allocation12], %s2702_s26, %s2702_s26, %s2703_s29  }
  0x2c   : > { %2740 = sst [smem:[#allocation26_spill]] %s2325_s5  ;;  %s44_s13 = ssub.s32 %s2156_s24, %s2325_s5 }
  0x2d   : > { %p45_p12 = scmp.eq.s32.totalorder %s44_s13, 0  ;;  %p55_p0 = scmp.eq.s32.totalorder %s2156_s24, 0 }
  0x2e   : > { %p2338_p5 = por %p414_p2, %p54_p13  ;;  %p1742_p7 = scmp.lt.s32.totalorder %s2156_s24, 2 }
  0x2f   : > { %s2334_s28 = scalar_select %p45_p12, %s2152_s23, %s47_s0  }
  0x30   : > { %p56_p3 = por %p55_p0, %p54_p13  ;;  %s2709_s18 = sand.u32 1, %s2152_s23  }
  0x31   : > { %2741 = sst [smem:[#allocation27_spill]] %s2334_s28  ;;  %s2346_s21 = sshll.u32 %s2709_s18, 3 }
  0x32   : > { %s2742_s19 = scalar_select %p2338_p5, 1, 0 }
  0x33   : > { %s2349_s30 = sshll.u32 %s2156_s24, 3  ;;  %p2351_p9 = pnand %p1742_p7, %p56_p3 }
  0x34   : > { %2743 = sst [smem:[#allocation28_spill]] %s2742_s19  ;;  %s2713_s0 = sand.u32 1, %s2156_s24  }
  0x35   : > { %s2745_s1 = sld [smem:[#allocation30_spill]]  ;;  %s543_s5 = scalar_lea.vmem [#allocation5], %s2346_s21 }
  0x36   : > { %s551_s19 = sshll.u32 %s543_s5, 4  ;;  %s2363_s18 = scalar_lea.sflag [#allocation6], %s2713_s0  ;;  %s552_s19 = int_to_ptr.vmem [resolvable:$true] %s551_s19 }
  0x37   : > { %p1894_p12 = pneg %p2351_p9 }
  0x3b   : > { %s547_s4 = scalar_lea.hbm %s2745_s1, %s2349_s30 }
  0x3c   : > { %s549_s28 = sshll.u32 %s547_s4, 4  ;;  %s1897_s4 = scalar_lea.hbm %s2745_s1, 16  ;;  %s550_s28 = int_to_ptr.hbm [resolvable:$true] %s549_s28 }
  0x3d   : > { %s1890_s16 = sshra.s32 %s550_s28, 4  ;;  %s1891_s16 = int_to_ptr.hbm [resolvable:$true] %s1890_s16 }
  0x3e   : > { %s1892_s11 = scalar_lea.hbm %s1891_s16, 8  ;;  %p1898_p3 = scmp.lt.s32.totalorder %s1891_s16, %s2745_s1 }
  0x3f   : > { %p1893_p2 = scmp.ne.s32.totalorder %s1891_s16, %s1892_s11  ;;  %p1899_p7 = scmp.lt.s32.totalorder %s1897_s4, %s1892_s11 }
  0x41   : > { %p1895_p13 = pnand %p1894_p12, %p1893_p2  ;;  %p1900_p11 = por %p1899_p7, %p1898_p3 }
  0x43   : > { %p1896_p0 = pneg %p1895_p13 }
  0x45   : > { %p1901_p1 = pnand %p1900_p11, %p1896_p0 }
  0x47   : > { %1904 = shalt.err (!%p1901_p1)
}
  0x48   : > { %1727 = dma.hbm_to_vmem [thread:$0]  (!%p2351_p9), %s550_s28, 128, %s552_s19, %s2363_s18  }
  0x49   : > { %s2746_s6 = sld [smem:[#allocation33_spill]]  ;;  %s2164_s29 = smov [#allocation13]  }
  0x4a   : > { %s468_s12 = sshll.u32 %s2164_s29, 4  ;;  %s2747_s9 = sld [smem:[#allocation35_spill]]  ;;  %s469_s12 = int_to_ptr.vmem [resolvable:$true] %s468_s12 }
  0x4b   : > { %s2748_s5 = smov 8   ;;  %s2749_s1 = smov 128  }
  0x4c   : > { %s2165_s28 = smov [#allocation14]   ;;  %s2751_s29 = smov 1  }
  0x4d   : > { %s488_s19 = sshll.u32 %s2165_s28, 4  ;;  %s2752_s15 = smov 16   ;;  %s489_s19 = int_to_ptr.vmem [resolvable:$true] %s488_s19 }
  0x4e   : > { %s524_s16 = scalar_lea.vmem [#allocation2], %s2346_s21  ;;  %s2753_s14 = sand.u32 1, %s2152_s23  }
  0x4f   : > { %s466_s26 = sshll.u32 %s2746_s6, 4  ;;  %s2750_s6 = sld [smem:[#allocation29_spill]]  ;;  %s467_s26 = int_to_ptr.hbm [resolvable:$true] %s466_s26 }
  0x50   : > { %s486_s4 = sshll.u32 %s2747_s9, 4  ;;  %s532_s9 = sshll.u32 %s524_s16, 4  ;;  %s487_s4 = int_to_ptr.hbm [resolvable:$true] %s486_s4  ;;  %s533_s9 = int_to_ptr.vmem [resolvable:$true] %s532_s9 }
  0x51   : > { %1717 = dma.hbm_to_vmem [thread:$0]  (!%p2306_p10), %s467_s26, 2048, %s469_s12, [#allocation12], %s2749_s1, %s2749_s1, %s2748_s5  }
  0x52   : > { %1720 = dma.hbm_to_vmem [thread:$0]  (!%p2306_p10), %s487_s4, 48, %s489_s19, [#allocation15], %s2752_s15, %s2752_s15, %s2751_s29  }
  0x53   : > { %s521_s1 = scalar_lea.sflag [#allocation3], %s2753_s14 }
  0x55   : > { %s528_s7 = scalar_lea.hbm %s2750_s6, %s2349_s30  ;;  %s1987_s28 = scalar_lea.hbm %s2750_s6, 16 }
  0x56   : > { %s530_s11 = sshll.u32 %s528_s7, 4  ;;  %s531_s11 = int_to_ptr.hbm [resolvable:$true] %s530_s11 }
  0x57   : > { %s1980_s26 = sshra.s32 %s531_s11, 4  ;;  %s1981_s26 = int_to_ptr.hbm [resolvable:$true] %s1980_s26 }
  0x58   : > { %s1982_s12 = scalar_lea.hbm %s1981_s26, 8  ;;  %p1988_p10 = scmp.lt.s32.totalorder %s1981_s26, %s2750_s6 }
  0x59   : > { %p1983_p1 = scmp.ne.s32.totalorder %s1981_s26, %s1982_s12  ;;  %p1989_p13 = scmp.lt.s32.totalorder %s1987_s28, %s1982_s12 }
  0x5b   : > { %p1985_p11 = pnand %p1983_p1, %p1894_p12  ;;  %p1990_p0 = por %p1989_p13, %p1988_p10 }
  0x5d   : > { %p1986_p2 = pneg %p1985_p11 }
  0x5f   : > { %p1991_p3 = pnand %p1990_p0, %p1986_p2 }
  0x61   : > { %1994 = shalt.err (!%p1991_p3)
}
  0x62   : > { %1724 = dma.hbm_to_vmem [thread:$0]  (!%p2351_p9), %s531_s11, 128, %s533_s9, %s521_s1  }
  0x63   : > { %s566_s19 = scalar_lea.hbm %s2683_s2, %s2349_s30  ;;  %s562_s0 = scalar_lea.vmem [#allocation7], %s2346_s21 }
  0x64   : > { %s568_s10 = sshll.u32 %s566_s19, 4  ;;  %s570_s29 = sshll.u32 %s562_s0, 4  ;;  %s569_s10 = int_to_ptr.hbm [resolvable:$true] %s568_s10  ;;  %s571_s29 = int_to_ptr.vmem [resolvable:$true] %s570_s29 }
  0x65   : > { %s2010_s16 = sshra.s32 %s569_s10, 4  ;;  %s2017_s9 = scalar_lea.hbm %s2683_s2, 16  ;;  %s2011_s16 = int_to_ptr.hbm [resolvable:$true] %s2010_s16 }
  0x66   : > { %s2012_s26 = scalar_lea.hbm %s2011_s16, 8  ;;  %p2018_p2 = scmp.lt.s32.totalorder %s2011_s16, %s2683_s2 }
  0x67   : > { %p2013_p7 = scmp.ne.s32.totalorder %s2011_s16, %s2012_s26  ;;  %p2019_p10 = scmp.lt.s32.totalorder %s2017_s9, %s2012_s26 }
  0x69   : > { %p2015_p1 = pnand %p2013_p7, %p1894_p12  ;;  %p2020_p13 = por %p2019_p10, %p2018_p2 }
  0x6b   : > { %p2016_p11 = pneg %p2015_p1 }
  0x6d   : > { %p2021_p0 = pnand %p2020_p13, %p2016_p11 }
  0x6f   : > { %2024 = shalt.err (!%p2021_p0)
}
  0x70   : > { %1730 = dma.hbm_to_vmem [thread:$0]  (!%p2351_p9), %s569_s10, 128, %s571_s29, %s2363_s18  }
  0x71   : > { %s585_s15 = scalar_lea.hbm %s2684_s3, %s2349_s30  ;;  %s581_s14 = scalar_lea.vmem [#allocation8], %s2346_s21 }
  0x72   : > { %s587_s7 = sshll.u32 %s585_s15, 4  ;;  %s589_s4 = sshll.u32 %s581_s14, 4  ;;  %s588_s7 = int_to_ptr.hbm [resolvable:$true] %s587_s7  ;;  %s590_s4 = int_to_ptr.vmem [resolvable:$true] %s589_s4 }
  0x73   : > { %s2754_s19 = sand.u32 1, %s2156_s24   ;;  %s2040_s16 = sshra.s32 %s588_s7, 4  ;;  %s2041_s16 = int_to_ptr.hbm [resolvable:$true] %s2040_s16 }
  0x74   : > { %s578_s0 = scalar_lea.sflag [#allocation9], %s2754_s19  ;;  %s2042_s26 = scalar_lea.hbm %s2041_s16, 8 }
  0x75   : > { %p2043_p3 = scmp.ne.s32.totalorder %s2041_s16, %s2042_s26  ;;  %s2047_s29 = scalar_lea.hbm %s2684_s3, 16 }
  0x76   : > { %p2048_p11 = scmp.lt.s32.totalorder %s2041_s16, %s2684_s3  ;;  %p2049_p2 = scmp.lt.s32.totalorder %s2047_s29, %s2042_s26 }
  0x77   : > { %p2045_p7 = pnand %p2043_p3, %p1894_p12 }
  0x78   : > { %p2050_p10 = por %p2049_p2, %p2048_p11 }
  0x79   : > { %p2046_p1 = pneg %p2045_p7 }
  0x7b   : > { %p2051_p13 = pnand %p2050_p10, %p2046_p1 }
  0x7d   : > { %2054 = shalt.err (!%p2051_p13)
}
  0x7e   : > { %1733 = dma.hbm_to_vmem [thread:$0]  (!%p2351_p9), %s588_s7, 128, %s590_s4, %s578_s0  }
  0x7f   : > { %598 = sbr.rel (%p2298_p8) target bundleno = 2616 (0xa38), region = 84  ;;  %s2451_s21 = sand.u32 (!%p2298_p8), 1, %s2148_s22  }
  0x80   : > { %s2454_s20 = sshll.u32 (!%p2298_p8), %s2451_s21, 3  ;;  %s601_s9 = scalar_lea.sflag (!%p2298_p8), [#allocation3], %s2451_s21 }
  0x81   : > { %s604_s11 = scalar_lea.vmem (!%p2298_p8), [#allocation2], %s2454_s20 }
  0x84   : > { %2115 = dma.done.wait (%p2285_p4), %s601_s9, 128  }
  0x85   : > { %2117 = vsyncadd (%p2285_p4), %s601_s9, 4294967168  ;;  %s610_s17 = sand.u32 1, %s2276_s25   ;;  %s614_s1 = scalar_lea.vmem [#allocation5], %s2454_s20 }
  0x86   : > { %s611_s13 = scalar_lea.sflag [#allocation6], %s610_s17 }
  0x87   : > { %2119 = dma.done.wait (%p2285_p4), %s611_s13, 256  }
  0x88   : > { %2121 = vsyncadd (%p2285_p4), %s611_s13, 4294967040  ;;  %s624_s5 = scalar_lea.vmem [#allocation7], %s2454_s20  ;;  %s631_s28 = scalar_lea.sflag [#allocation9], %s610_s17 }
  0x89   : > { %s634_s15 = scalar_lea.vmem [#allocation8], %s2454_s20 }
  0x8a   : > { %2123 = dma.done.wait (%p2285_p4), %s631_s28, 128  }
  0x8b   : > { %2125 = vsyncadd (%p2285_p4), %s631_s28, 4294967168  ;;  %p2755_p8 = scmp.eq.s32.totalorder %s2276_s25, 0 }
  0x8d   : > { %2127 = dma.done.wait (%p2755_p8), [#allocation9], 2048   ;;  %p2756_p9 = pmov %p2755_p8 }
  0x8e   : > { %p2757_p12 = pmov %p2755_p8 }
  0x8f   : > { %2129 = vsyncadd (%p2756_p9), [#allocation9], 4294965248 }
  0x90   : > { %2131 = dma.done.wait (%p2757_p12), [#allocation12], 2112   ;;  %p2758_p0 = pmov %p2755_p8 }
  0x92   : > { %2133 = vsyncadd (%p2758_p0), [#allocation12], 4294965184  ;;  %p2759_p3 = pmov %p2758_p0 }
  0x93   : > { %p2760_p7 = pmov %p2758_p0 }
  0x94   : > { %2135 = dma.done.wait (%p2759_p3), [#allocation15], 48  }
  0x95   : > { %2137 = vsyncadd (%p2760_p7), [#allocation15], 4294967248  ;;  %vm737_vm0 = vcmask 261120   ;;  %v2486_v0 = vld [vmem:[%s604_s11] sm:$0xff]  ;;  %v2166_v2 = vmov 32.0   ;;  %v794_v14 = vld [vmem:[#allocation10 + $0x18] sm:$0xff] }
  0x96   : > { %v738_v1 = vsel %vm737_vm0, %v2486_v0, 0.0  ;;  %1808 = vrcp.f32 %v2166_v2  ;;  %v826_v15 = vld [vmem:[#allocation10 + $0x38] sm:$0xff]  ;;  %v793_v16 = vld [vmem:[#allocation10 + $0x10] sm:$0xff]  ;;  %814 = vmatpush.msra.mxu0 %v794_v14  ;;  %v792_v18 = vld [vmem:[#allocation10 + $0x8] sm:$0xff]  ;;  %s2761_s19 = sld [smem:[#allocation40_spill]]  ;;  %s2167_s30 = smov 8  }
  0x97   : > { %739 = vadd.xlane.f32.xlu0 %v738_v1  ;;  %844 = vmatpush.msra.mxu2 %v826_v15  ;;  %v825_v17 = vld [vmem:[#allocation10 + $0x30] sm:$0xff]  ;;  %v824_v19 = vld [vmem:[#allocation10 + $0x28] sm:$0xff]  ;;  %v791_v20 = vld [vmem:[#allocation10] sm:$0xff]  ;;  %s2168_s12 = smov 24   ;;  %s2169_s9 = smov 16   ;;  %vm900_vm8 = vcmask 64512  }
  0x98   : > { %815 = vmatpush.msra.mxu0 %v793_v16  ;;  %v823_v21 = vld [vmem:[#allocation10 + $0x20] sm:$0xff]  ;;  %v856_v28 = vld [vmem:[#allocation10 + $0x58] sm:$0xff]  ;;  %v855_v29 = vld [vmem:[#allocation10 + $0x50] sm:$0xff]  ;;  %vm902_vm9 = vcmask 130048   ;;  %vm904_vm10 = vcmask 195584   ;;  %s2763_s18 = sld [smem:[#allocation34_spill]] }
  0x99   : > { %845 = vmatpush.msra.mxu2 %v825_v17  ;;  %v854_v31 = vld [vmem:[#allocation10 + $0x48] sm:$0xff]  ;;  %v853_v33 = vld [vmem:[#allocation10 + $0x40] sm:$0xff]  ;;  %s2764_s13 = sld [smem:[#allocation36_spill]]  ;;  %s718_s14 = scalar_lea.vmem [#allocation16], %s2454_s20 }
  0x9a   : > { %816 = vmatpush.msra.mxu0 %v792_v18  ;;  %v1792_v43 = vld [vmem:[%s2689_s8] ss:$0 sm:$0xff]  ;;  %v1793_v50 = vld [vmem:[#allocation14] ss:$0 sm:$0xff]  ;;  %v1795_v61 = vld [vmem:[#allocation11 + $0x1] ss:$0 sm:$0xff] }
  0x9b   : > { %846 = vmatpush.msra.mxu2 %v824_v19  ;;  %v721_v58 = vld [vmem:[%s624_s5] sm:$0xff]  ;;  %s2762_s5 = sld [smem:[#allocation41_spill]]  ;;  %s1445_s4 = sshll.u32 %s718_s14, 4  ;;  %s1446_s4 = int_to_ptr.vmem [resolvable:$true] %s1445_s4 }
  0x9c   : > { %v1809_v3 = vpop.eup %1808  ;;  %817 = vmatpush.msra.mxu0 %v791_v20  ;;  %v730_v54 = vld [vmem:[%s2761_s19 + $0x18] sm:$0xff]  ;;  %v729_v55 = vld [vmem:[%s2761_s19 + $0x10] sm:$0xff]  ;;  %v728_v56 = vld [vmem:[%s2761_s19 + $0x8] sm:$0xff]  ;;  %v1647_v59 = vadd.f32 -1.0, %v721_v58  ;;  %s2765_s26 = sld [smem:[#allocation38_spill]] }
  0x9d   : > { %v742_v4 = vmul.f32 32.0, %v1809_v3  ;;  %vm746_vm1 = vweird.f32 %v1809_v3  ;;  %847 = vmatpush.msra.mxu2 %v823_v21  ;;  %982 = vmatpush.msra.mxu1 %v730_v54  ;;  %v727_v57 = vld [vmem:[%s2761_s19] sm:$0xff]  ;;  %s2767_s11 = sld [smem:[#allocation42_spill]] }
  0x9e   : > { %v723_v60 = vmul.f32 1e+09, %v1647_v59  ;;  %v1796_v2 = vld [vmem:[#allocation11 + $0x2] ss:$0 sm:$0xff]  ;;  %s2768_s27 = sld [smem:[#allocation39_spill]] }
  0x9f   : > { %v743_v5 = vsub.f32 1.0, %v742_v4  ;;  %874 = vmatpush.msrb.mxu2 %v856_v28  ;;  %983 = vmatpush.msra.mxu1 %v729_v55 }
  0xa0   : > { %891 = vrot.lane.b32.xlu1 %v723_v60, %s2167_s30  ;;  %897 = vrot.lane.b32.xlu2 %v723_v60, %s2168_s12 }
  0xa1   : > { %v744_v6 = vmul.f32 %v1809_v3, %v743_v5  ;;  %875 = vmatpush.msrb.mxu2 %v855_v29  ;;  %984 = vmatpush.msra.mxu1 %v728_v56  ;;  %v996_v29 = vld [vmem:[#allocation10 + $0x78] sm:$0xff] }
  0xa3   : > { %v745_v7 = vadd.f32 %v1809_v3, %v744_v6  ;;  %876 = vmatpush.msrb.mxu2 %v854_v31  ;;  %985 = vmatpush.msra.mxu1 %v727_v57  ;;  %v994_v31 = vld [vmem:[#allocation10 + $0x68] sm:$0xff]  ;;  %s2090_s20 = scalar_lea.hbm %s2767_s11, 16 }
  0xa5   : > { %v2490_v8 = vsel %vm746_vm1, %v1809_v3, %v745_v7  ;;  %877 = vmatpush.msrb.mxu2 %v853_v33 }
  0xa8   : > { %894 = vrot.lane.b32.xlu1 %v723_v60, %s2169_s9 }
  0xfa   : > { %v898_v20 = vpop.permute.xlu2 %897 }
 0x10a   : > { %v740_v9 = vpop.xlane.xlu0 %739 }
 0x10b   : > { %v748_v10 = vmul.f32 %v2490_v8, %v740_v9 }
 0x10d   : > { %v749_v11 = vsub.f32 %v2486_v0, %v748_v10  ;;  %v1794_v10 = vld [vmem:[#allocation11] ss:$0 sm:$0xff] }
 0x10f   : > { %v750_v12 = vmul.f32 %v749_v11, %v749_v11  ;;  %v758_v48 = vmul.f32 %v1792_v43, %v749_v11 }
 0x111   : > { %v751_v13 = vsel %vm737_vm0, %v750_v12, 0.0 }
 0x112   : > { %752 = vadd.xlane.f32.xlu0 %v751_v13  ;;  %v892_v16 = vpop.permute.xlu1 %891 }
 0x113   : > { %v901_v17 = vsel %vm900_vm8, %v723_v60, %v892_v16 }
 0x11a   : > { %v895_v18 = vpop.permute.xlu1 %894 }
 0x11b   : > { %v903_v19 = vsel %vm902_vm9, %v901_v17, %v895_v18  ;;  %v1799_v17 = vld [vmem:[#allocation14 + $0x1] ss:$0 sm:$0xff] }
 0x11c   : > { %v905_v21 = vsel %vm904_vm10, %v903_v19, %v898_v20 }
 0x185   : > { %v753_v22 = vpop.xlane.xlu0 %752 }
 0x186   : > { %v754_v23 = vmul.f32 0.032258064, %v753_v22 }
 0x188   : > { %1810 = vrsqrt.f32 %v754_v23  ;;  %vm766_vm2 = vcmp.eq.f32.partialorder %v754_v23, inf  ;;  %v769_v35 = vand.u32 2147483648, %v754_v23  ;;  %vm768_vm3 = vcmp.eq.f32.partialorder %v754_v23, 0.0 }
 0x18e   : > { %v1811_v24 = vpop.eup %1810 }
 0x18f   : > { %v760_v25 = vmul.f32 %v1811_v24, %v754_v23 }
 0x191   : > { %v761_v26 = vmul.f32 %v1811_v24, %v760_v25 }
 0x193   : > { %v762_v27 = vmul.f32 0.5, %v761_v26 }
 0x195   : > { %v763_v30 = vsub.f32 1.5, %v762_v27 }
 0x197   : > { %v764_v32 = vmul.f32 %v1811_v24, %v763_v30  ;;  %v995_v30 = vld [vmem:[#allocation10 + $0x70] sm:$0xff] }
 0x199   : > { %v765_v34 = vmul.f32 %v764_v32, %v754_v23  ;;  %v993_v32 = vld [vmem:[#allocation10 + $0x60] sm:$0xff] }
 0x19b   : > { %v767_v36 = vsel %vm766_vm2, %v754_v23, %v765_v34 }
 0x19c   : > { %v770_v37 = vsel %vm768_vm3, %v769_v35, %v767_v36 }
 0x19d   : > { %v771_v38 = vadd.f32 1e-06, %v770_v37  ;;  %v1797_v37 = vld [vmem:[#allocation11 + $0x3] ss:$0 sm:$0xff] }
 0x19f   : > { %1812 = vrcp.f32 %v771_v38  ;;  %v783_v42 = vand.u32 2147483648, %v771_v38  ;;  %v781_v45 = vand.u32 2147483647, %v771_v38  ;;  %vm777_vm5 = vweird.f32 %v771_v38 }
 0x1a1   : > { %v784_v47 = vor.u32 1.1754944e-38, %v783_v42  ;;  %vm782_vm7 = vcmp.eq.f32.partialorder %v781_v45, 8.507059e+37 }
 0x1a5   : > { %v1813_v39 = vpop.eup %1812 }
 0x1a6   : > { %v773_v40 = vmul.f32 %v1813_v39, %v771_v38  ;;  %vm778_vm4 = vweird.f32 %v1813_v39 }
 0x1a7   : > { %vm779_vm6 = vmor %vm777_vm5, %vm778_vm4 }
 0x1a8   : > { %v774_v41 = vsub.f32 1.0, %v773_v40 }
 0x1aa   : > { %v775_v44 = vmul.f32 %v1813_v39, %v774_v41 }
 0x1ac   : > { %v776_v46 = vadd.f32 %v1813_v39, %v775_v44 }
 0x1ae   : > { %v780_v49 = vsel %vm779_vm6, %v1813_v39, %v776_v46 }
 0x1af   : > { %v785_v51 = vsel %vm782_vm7, %v784_v47, %v780_v49  ;;  %v1111_v47 = vld [vmem:[#allocation13 + $0x38] sm:$0xff]  ;;  %v1108_v49 = vld [vmem:[#allocation13 + $0x20] sm:$0xff] }
 0x1b0   : > { %v786_v52 = vmul.f32 %v785_v51, %v758_v48  ;;  %1132 = vmatpush.msrb.mxu1 %v1111_v47  ;;  %v1110_v48 = vld [vmem:[#allocation13 + $0x30] sm:$0xff]  ;;  %v1079_v51 = vld [vmem:[#allocation13 + $0x18] sm:$0xff] }
 0x1b2   : > { %v790_v53 = vadd.f32 %v1793_v50, %v786_v52  ;;  %1133 = vmatpush.msrb.mxu1 %v1110_v48  ;;  %v2540_v50 = vld [vmem:[%s614_s1] sm:$0xff] }
 0x1b3   : > { %v1078_v52 = vld [vmem:[#allocation13 + $0x10] sm:$0xff] }
 0x1b4   : > { %1649 = vmatmul.msk.f32.vlgmr.msra.gmra.mxu0 %vm737_vm0, %v790_v53  ;;  %1650 = vmatmul.msk.f32.vlgmr.msra.gmra.mxu2 %vm737_vm0, %v790_v53 }
 0x1b5   : > { %1017 = vmatpush.msra.mxu2 %v996_v29 }
 0x1b7   : > { %1018 = vmatpush.msra.mxu2 %v995_v30 }
 0x1b9   : > { %1019 = vmatpush.msra.mxu2 %v994_v31 }
 0x1bb   : > { %1020 = vmatpush.msra.mxu2 %v993_v32  ;;  %v724_v32 = vld [vmem:[%s634_s15] sm:$0xff]  ;;  %s2766_s15 = sld [smem:[#allocation37_spill]] }
 0x1bc   : > { %1651 = vmatmul.msk.f32.vlgmr.msrb.gmra.mxu2 %vm737_vm0, %v790_v53  ;;  %v1077_v53 = vld [vmem:[#allocation13 + $0x8] sm:$0xff] }
 0x231   : > { %v819_v11 = vpop.f32.mrf.mxu0 }
 0x232   : > { %v820_v15 = vadd.f32 %v1794_v10, %v819_v11  ;;  %v1798_v10 = vld [vmem:[%s2689_s8 + $0x1] ss:$0 sm:$0xff] }
 0x237   : > { %v849_v62 = vpop.f32.mrf.mxu2 }
 0x238   : > { %v850_v63 = vadd.f32 %v1795_v61, %v849_v62 }
 0x23a   : > { %v885_v1 = vmul.f32 %v850_v63, %v730_v54  ;;  %v884_v3 = vmul.f32 %v850_v63, %v729_v55  ;;  %v883_v6 = vmul.f32 %v850_v63, %v728_v56  ;;  %v882_v12 = vmul.f32 %v850_v63, %v727_v57 }
 0x23c   : > { %1652 = vmatpush.xpose.msk.msra.mxu3 %vm737_vm0, %v885_v1 }
 0x23f   : > { %v879_v4 = vpop.f32.mrf.mxu2 }
 0x240   : > { %v880_v5 = vadd.f32 %v1796_v2, %v879_v4  ;;  %1653 = vmatpush.xpose.msk.msra.mxu3 %vm737_vm0, %v884_v3 }
 0x242   : > { %v889_v7 = vmul.f32 %v880_v5, %v730_v54  ;;  %v888_v9 = vmul.f32 %v880_v5, %v729_v55  ;;  %v887_v13 = vmul.f32 %v880_v5, %v728_v56  ;;  %v886_v14 = vmul.f32 %v880_v5, %v727_v57  ;;  %v1076_v54 = vld [vmem:[#allocation13] sm:$0xff] }
 0x244   : > { %1654 = vmatpush.xpose.msk.msra.mxu3 %vm737_vm0, %v883_v6  ;;  %962 = vmatpush.msrb.mxu0 %v889_v7 }
 0x246   : > { %963 = vmatpush.msrb.mxu0 %v888_v9 }
 0x248   : > { %1655 = vmatpush.xpose.msk.msra.mxu3 %vm737_vm0, %v882_v12  ;;  %964 = vmatpush.msrb.mxu0 %v887_v13 }
 0x24a   : > { %965 = vmatpush.msrb.mxu0 %v886_v14 }
 0x24b   : > { %1656 = vmatmul.msk.f32.vlgmr.msra.gmra.mxu3 %vm737_vm0, %v820_v15 }
 0x24c   : > { %1099 = vmatpush.msra.mxu0 %v1079_v51 }
 0x24e   : > { %1100 = vmatpush.msra.mxu0 %v1078_v52  ;;  %v1802_v52 = vld [vmem:[%s2763_s18 + $0x2] ss:$0 sm:$0xff] }
 0x250   : > { %1101 = vmatpush.msra.mxu0 %v1077_v53 }
 0x252   : > { %1102 = vmatpush.msra.mxu0 %v1076_v54 }
 0x2ce   : > { %v938_v22 = vpop.f32.mrf.mxu3 }
 0x2cf   : > { %v939_v23 = vadd.f32 %v938_v22, %v905_v21  ;;  %v734_v21 = vld [vmem:[%s2762_s5 + $0x18] sm:$0xff]  ;;  %v733_v22 = vld [vmem:[%s2762_s5 + $0x10] sm:$0xff] }
 0x2d1   : > { %v941_v24 = vsel %vm737_vm0, %v939_v23, -inf }
 0x2d2   : > { %942 = vmax.xlane.f32.xlu2 %v941_v24  ;;  %v731_v24 = vld [vmem:[%s2762_s5] sm:$0xff] }
 0x345   : > { %v943_v25 = vpop.xlane.xlu2 %942 }
 0x346   : > { %v944_v26 = vsub.f32 %v939_v23, %v943_v25  ;;  %v732_v23 = vld [vmem:[%s2762_s5 + $0x8] sm:$0xff]  ;;  %v1800_v25 = vld [vmem:[%s2763_s18 + $0x1] ss:$0 sm:$0xff] }
 0x348   : > { %v945_v27 = vmul.f32 1.442695, %v944_v26 }
 0x34a   : > { %1814 = vpow2.f32 %v945_v27 }
 0x350   : > { %v1815_v28 = vpop.eup %1814 }
 0x351   : > { %1657 = vmatmul.msk.f32.vlgmr.msrb.gmra.mxu0 %vm737_vm0, %v1815_v28  ;;  %1658 = vmatmul.msk.f32.vlgmr.msra.gmra.mxu1 %vm737_vm0, %v1815_v28 }
 0x3ce   : > { %v987_v33 = vpop.f32.mrf.mxu1  ;;  %v967_v35 = vpop.f32.mrf.mxu0 }
 0x3cf   : > { %1816 = vrcp.f32 %v987_v33  ;;  %v1648_v33 = vadd.f32 -1.0, %v724_v32 }
 0x3d5   : > { %v1817_v34 = vpop.eup %1816 }
 0x3d6   : > { %v991_v36 = vmul.f32 %v1817_v34, %v967_v35  ;;  %v726_v34 = vmul.f32 1e+09, %v1648_v33  ;;  %v1144_v35 = vld [vmem:[#allocation13 + $0x58] sm:$0xff] }
 0x3d7   : > { %1162 = vmatpush.msrb.mxu2 %v1144_v35 }
 0x3d8   : > { %1659 = vmatmul.msk.f32.vlgmr.msra.gmra.mxu2 %vm737_vm0, %v991_v36  ;;  %1185 = vrot.lane.b32.xlu2 %v726_v34, %s2168_s12  ;;  %v1143_v36 = vld [vmem:[#allocation13 + $0x50] sm:$0xff] }
 0x3d9   : > { %1163 = vmatpush.msrb.mxu2 %v1143_v36 }
 0x432   : > { %v1186_v47 = vpop.permute.xlu2 %1185 }
 0x45b   : > { %v1022_v38 = vpop.f32.mrf.mxu2 }
 0x45c   : > { %v1023_v39 = vadd.f32 %v1797_v37, %v1022_v38  ;;  %v1801_v37 = vld [vmem:[%s2763_s18] ss:$0 sm:$0xff] }
 0x45e   : > { %v2531_v40 = vadd.f32 %v1023_v39, %v2486_v0  ;;  %v1109_v0 = vld [vmem:[#allocation13 + $0x28] sm:$0xff] }
 0x45f   : > { %1134 = vmatpush.msrb.mxu1 %v1109_v0 }
 0x460   : > { %v1030_v41 = vsel %vm737_vm0, %v2531_v40, 0.0 }
 0x461   : > { %1031 = vadd.xlane.f32.xlu0 %v1030_v41  ;;  %1135 = vmatpush.msrb.mxu1 %v1108_v49  ;;  %v1142_v41 = vld [vmem:[#allocation13 + $0x48] sm:$0xff] }
 0x462   : > { %1663 = vmatmul.msk.f32.vlgmr.msrb.gmra.mxu1 %vm737_vm0, %v2540_v50  ;;  %1164 = vmatpush.msrb.mxu2 %v1142_v41 }
 0x463   : > { %1267 = vmatpush.msra.mxu1 %v734_v21 }
 0x465   : > { %1268 = vmatpush.msra.mxu1 %v733_v22 }
 0x467   : > { %1269 = vmatpush.msra.mxu1 %v732_v23 }
 0x469   : > { %1270 = vmatpush.msra.mxu1 %v731_v24 }
 0x475   : > { %1179 = vrot.lane.b32.xlu0 %v726_v34, %s2167_s30  ;;  %s1679_s30 = sshll.u32 %s2276_s25, 3  ;;  %s1433_s25 = scalar_lea.sflag [#allocation4], %s2451_s21 }
 0x476   : > { %s1443_s17 = scalar_lea.hbm %s2767_s11, %s1679_s30 }
 0x477   : > { %s1447_s0 = sshll.u32 %s1443_s17, 4  ;;  %s1448_s0 = int_to_ptr.hbm [resolvable:$true] %s1447_s0 }
 0x478   : > { %s2084_s16 = sshra.s32 %s1448_s0, 4  ;;  %s2085_s16 = int_to_ptr.hbm [resolvable:$true] %s2084_s16 }
 0x479   : > { %s2086_s10 = scalar_lea.hbm %s2085_s16, 8  ;;  %p2091_p2 = scmp.lt.s32.totalorder %s2085_s16, %s2767_s11 }
 0x47a   : > { %p2087_p4 = scmp.ne.s32.totalorder %s2085_s16, %s2086_s10  ;;  %p2092_p10 = scmp.lt.s32.totalorder %s2090_s20, %s2086_s10 }
 0x47c   : > { %p2088_p1 = pnand %p2087_p4, %p2338_p5  ;;  %p2093_p13 = por %p2092_p10, %p2091_p2 }
 0x47d   : > { %1182 = vrot.lane.b32.xlu0 %v726_v34, %s2169_s9 }
 0x47e   : > { %p2089_p11 = pneg %p2088_p1 }
 0x480   : > { %p2094_p8 = pnand %p2093_p13, %p2089_p11 }
 0x4d4   : > { %v1032_v42 = vpop.xlane.xlu0 %1031 }
 0x4d5   : > { %v1033_v43 = vmul.f32 %v1032_v42, %v2490_v8  ;;  %v1141_v42 = vld [vmem:[#allocation13 + $0x40] sm:$0xff] }
 0x4d6   : > { %1165 = vmatpush.msrb.mxu2 %v1141_v42 }
 0x4d7   : > { %v1034_v44 = vsub.f32 %v2531_v40, %v1033_v43  ;;  %1665 = vmatmul.msk.f32.vlgmr.msrb.gmra.mxu2 %vm737_vm0, %v2540_v50 }
 0x4d9   : > { %v1035_v45 = vmul.f32 %v1034_v44, %v1034_v44  ;;  %v1043_v15 = vmul.f32 %v1798_v10, %v1034_v44 }
 0x4db   : > { %v1036_v46 = vsel %vm737_vm0, %v1035_v45, 0.0 }
 0x4dc   : > { %1037 = vadd.xlane.f32.xlu1 %v1036_v46 }
 0x4df   : > { %v1137_v26 = vpop.f32.mrf.mxu1 }
 0x4e0   : > { %v1138_v27 = vadd.f32 %v1800_v25, %v1137_v26  ;;  %v1400_v26 = vld [vmem:[%s2765_s26 + $0x38] sm:$0xff] }
 0x4e1   : > { %1413 = vmatpush.msrb.mxu1 %v1400_v26 }
 0x4e2   : > { %v1173_v28 = vmul.f32 %v1138_v27, %v734_v21  ;;  %v1172_v29 = vmul.f32 %v1138_v27, %v733_v22  ;;  %v1171_v30 = vmul.f32 %v1138_v27, %v732_v23  ;;  %v1170_v31 = vmul.f32 %v1138_v27, %v731_v24  ;;  %v1399_v27 = vld [vmem:[%s2765_s26 + $0x30] sm:$0xff] }
 0x4e3   : > { %1414 = vmatpush.msrb.mxu1 %v1399_v27 }
 0x4e4   : > { %1666 = vmatpush.xpose.msk.msrb.mxu3 %vm737_vm0, %v1173_v28 }
 0x4e7   : > { %v1180_v43 = vpop.permute.xlu0 %1179 }
 0x4e8   : > { %1667 = vmatpush.xpose.msk.msrb.mxu3 %vm737_vm0, %v1172_v29  ;;  %v1188_v44 = vsel %vm900_vm8, %v726_v34, %v1180_v43  ;;  %v1398_v29 = vld [vmem:[%s2765_s26 + $0x28] sm:$0xff]  ;;  %v1396_v34 = vld [vmem:[%s2765_s26 + $0x18] sm:$0xff]  ;;  %v1804_v43 = vld [vmem:[%s2689_s8 + $0x2] ss:$0 sm:$0xff]  ;;  %vm1401_vm8 = vcmask 523264  }
 0x4e9   : > { %1415 = vmatpush.msrb.mxu1 %v1398_v29 }
 0x4ec   : > { %1668 = vmatpush.xpose.msk.msrb.mxu3 %vm737_vm0, %v1171_v30 }
 0x4ef   : > { %v1183_v45 = vpop.permute.xlu0 %1182 }
 0x4f0   : > { %1669 = vmatpush.xpose.msk.msrb.mxu3 %vm737_vm0, %v1170_v31  ;;  %v1189_v46 = vsel %vm902_vm9, %v1188_v44, %v1183_v45  ;;  %v1397_v31 = vld [vmem:[%s2765_s26 + $0x20] sm:$0xff] }
 0x4f1   : > { %v1190_v48 = vsel %vm904_vm10, %v1189_v46, %v1186_v47  ;;  %1416 = vmatpush.msrb.mxu1 %v1397_v31 }
 0x4f3   : > { %1417 = vmatpush.msrb.mxu1 %v1396_v34 }
 0x54f   : > { %v1038_v55 = vpop.xlane.xlu1 %1037 }
 0x550   : > { %v1039_v56 = vmul.f32 0.032258064, %v1038_v55 }
 0x552   : > { %1818 = vrsqrt.f32 %v1039_v56  ;;  %vm1051_vm11 = vcmp.eq.f32.partialorder %v1039_v56, inf  ;;  %v1054_v1 = vand.u32 2147483648, %v1039_v56  ;;  %vm1053_vm12 = vcmp.eq.f32.partialorder %v1039_v56, 0.0 }
 0x558   : > { %v1819_v57 = vpop.eup %1818 }
 0x559   : > { %v1045_v58 = vmul.f32 %v1819_v57, %v1039_v56 }
 0x55a   : > { %v1167_v53 = vpop.f32.mrf.mxu2 }
 0x55b   : > { %v1046_v59 = vmul.f32 %v1819_v57, %v1045_v58  ;;  %v1168_v50 = vadd.f32 %v1802_v52, %v1167_v53 }
 0x55d   : > { %v1047_v60 = vmul.f32 0.5, %v1046_v59  ;;  %v1177_v54 = vmul.f32 %v1168_v50, %v734_v21  ;;  %v1176_v55 = vmul.f32 %v1168_v50, %v733_v22 }
 0x55f   : > { %v1048_v61 = vsub.f32 1.5, %v1047_v60  ;;  %1247 = vmatpush.msrb.mxu0 %v1177_v54  ;;  %v1394_v54 = vld [vmem:[%s2765_s26 + $0x8] sm:$0xff] }
 0x561   : > { %v1049_v62 = vmul.f32 %v1819_v57, %v1048_v61  ;;  %1248 = vmatpush.msrb.mxu0 %v1176_v55  ;;  %v1174_v57 = vmul.f32 %v1168_v50, %v731_v24  ;;  %v1393_v55 = vld [vmem:[%s2765_s26] sm:$0xff] }
 0x563   : > { %v1050_v63 = vmul.f32 %v1049_v62, %v1039_v56  ;;  %v1281_v62 = vld [vmem:[#allocation13 + $0x78] sm:$0xff] }
 0x564   : > { %1302 = vmatpush.msra.mxu2 %v1281_v62 }
 0x565   : > { %v1052_v2 = vsel %vm1051_vm11, %v1039_v56, %v1050_v63  ;;  %v1175_v56 = vmul.f32 %v1168_v50, %v732_v23  ;;  %v1280_v63 = vld [vmem:[#allocation13 + $0x70] sm:$0xff] }
 0x566   : > { %v1055_v3 = vsel %vm1053_vm12, %v1054_v1, %v1052_v2  ;;  %1303 = vmatpush.msra.mxu2 %v1280_v63  ;;  %v1279_v1 = vld [vmem:[#allocation13 + $0x68] sm:$0xff]  ;;  %v1278_v2 = vld [vmem:[#allocation13 + $0x60] sm:$0xff] }
 0x567   : > { %v1056_v4 = vadd.f32 1e-06, %v1055_v3  ;;  %1249 = vmatpush.msrb.mxu0 %v1175_v56  ;;  %v1395_v50 = vld [vmem:[%s2765_s26 + $0x10] sm:$0xff]  ;;  %v1806_v56 = vld [vmem:[%s2766_s15] ss:$0 sm:$0xff] }
 0x568   : > { %1304 = vmatpush.msra.mxu2 %v1279_v1  ;;  %1418 = vmatpush.msrb.mxu1 %v1395_v50 }
 0x569   : > { %1820 = vrcp.f32 %v1056_v4  ;;  %v1068_v9 = vand.u32 2147483648, %v1056_v4  ;;  %v1066_v12 = vand.u32 2147483647, %v1056_v4  ;;  %vm1062_vm14 = vweird.f32 %v1056_v4  ;;  %1250 = vmatpush.msrb.mxu0 %v1174_v57 }
 0x56a   : > { %1305 = vmatpush.msra.mxu2 %v1278_v2  ;;  %1419 = vmatpush.msrb.mxu1 %v1394_v54 }
 0x56b   : > { %v1069_v14 = vor.u32 1.1754944e-38, %v1068_v9  ;;  %vm1067_vm1 = vcmp.eq.f32.partialorder %v1066_v12, 8.507059e+37 }
 0x56c   : > { %1420 = vmatpush.msrb.mxu1 %v1393_v55 }
 0x56f   : > { %v1821_v5 = vpop.eup %1820 }
 0x570   : > { %v1058_v6 = vmul.f32 %v1821_v5, %v1056_v4  ;;  %vm1063_vm13 = vweird.f32 %v1821_v5 }
 0x571   : > { %vm1064_vm15 = vmor %vm1062_vm14, %vm1063_vm13 }
 0x572   : > { %v1059_v7 = vsub.f32 1.0, %v1058_v6 }
 0x574   : > { %v1060_v11 = vmul.f32 %v1821_v5, %v1059_v7  ;;  %v1803_v7 = vld [vmem:[%s2763_s18 + $0x3] ss:$0 sm:$0xff] }
 0x576   : > { %v1061_v13 = vadd.f32 %v1821_v5, %v1060_v11 }
 0x578   : > { %v1065_v16 = vsel %vm1064_vm15, %v1821_v5, %v1061_v13 }
 0x579   : > { %v1070_v18 = vsel %vm1067_vm1, %v1069_v14, %v1065_v16 }
 0x57a   : > { %v1071_v19 = vmul.f32 %v1070_v18, %v1043_v15  ;;  %v1364_v18 = vld [vmem:[%s2764_s13 + $0x18] sm:$0xff] }
 0x57c   : > { %v1075_v20 = vadd.f32 %v1799_v17, %v1071_v19  ;;  %v1362_v19 = vld [vmem:[%s2764_s13 + $0x8] sm:$0xff] }
 0x57e   : > { %1661 = vmatmul.msk.f32.vlgmr.msra.gmra.mxu0 %vm737_vm0, %v1075_v20 }
 0x57f   : > { %1384 = vmatpush.msra.mxu0 %v1364_v18 }
 0x5fb   : > { %v1104_v38 = vpop.f32.mrf.mxu0 }
 0x5fc   : > { %v1105_v39 = vadd.f32 %v1801_v37, %v1104_v38 }
 0x5fe   : > { %1670 = vmatmul.msk.f32.vlgmr.msrb.gmra.mxu3 %vm737_vm0, %v1105_v39 }
 0x681   : > { %v1223_v0 = vpop.f32.mrf.mxu3 }
 0x682   : > { %v1224_v49 = vadd.f32 %v1223_v0, %v1190_v48 }
 0x684   : > { %v1226_v51 = vsel %vm737_vm0, %v1224_v49, -inf }
 0x685   : > { %1227 = vmax.xlane.f32.xlu0 %v1226_v51 }
 0x6f8   : > { %v1228_v58 = vpop.xlane.xlu0 %1227 }
 0x6f9   : > { %v1229_v59 = vsub.f32 %v1224_v49, %v1228_v58  ;;  %v1805_v49 = vld [vmem:[#allocation14 + $0x2] ss:$0 sm:$0xff] }
 0x6fb   : > { %v1230_v60 = vmul.f32 1.442695, %v1229_v59 }
 0x6fd   : > { %1822 = vpow2.f32 %v1230_v60  ;;  %v1807_v60 = vld [vmem:[%s2768_s27] ss:$0 sm:$0xff] }
 0x703   : > { %v1823_v61 = vpop.eup %1822 }
 0x704   : > { %1671 = vmatmul.msk.f32.vlgmr.msrb.gmra.mxu0 %vm737_vm0, %v1823_v61  ;;  %1672 = vmatmul.msk.f32.vlgmr.msra.gmra.mxu1 %vm737_vm0, %v1823_v61 }
 0x781   : > { %v1272_v3 = vpop.f32.mrf.mxu1  ;;  %v1252_v5 = vpop.f32.mrf.mxu0 }
 0x782   : > { %1824 = vrcp.f32 %v1272_v3 }
 0x788   : > { %v1825_v4 = vpop.eup %1824 }
 0x789   : > { %v1276_v6 = vmul.f32 %v1825_v4, %v1252_v5 }
 0x78b   : > { %1674 = vmatmul.msk.f32.vlgmr.msra.gmra.mxu2 %vm737_vm0, %v1276_v6 }
 0x80e   : > { %v1307_v9 = vpop.f32.mrf.mxu2 }
 0x80f   : > { %v1308_v10 = vadd.f32 %v1803_v7, %v1307_v9 }
 0x811   : > { %v2592_v11 = vadd.f32 %v1308_v10, %v2531_v40  ;;  %v1363_v40 = vld [vmem:[%s2764_s13 + $0x10] sm:$0xff] }
 0x812   : > { %1385 = vmatpush.msra.mxu0 %v1363_v40 }
 0x813   : > { %v1315_v12 = vsel %vm737_vm0, %v2592_v11, 0.0 }
 0x814   : > { %1316 = vadd.xlane.f32.xlu1 %v1315_v12  ;;  %1386 = vmatpush.msra.mxu0 %v1362_v19 }
 0x887   : > { %v1317_v13 = vpop.xlane.xlu1 %1316 }
 0x888   : > { %v1318_v14 = vmul.f32 %v1317_v13, %v2490_v8  ;;  %v1361_v8 = vld [vmem:[%s2764_s13] sm:$0xff] }
 0x889   : > { %1387 = vmatpush.msra.mxu0 %v1361_v8 }
 0x88a   : > { %v1319_v15 = vsub.f32 %v2592_v11, %v1318_v14 }
 0x88c   : > { %v1320_v16 = vmul.f32 %v1319_v15, %v1319_v15  ;;  %v1328_v48 = vmul.f32 %v1804_v43, %v1319_v15 }
 0x88e   : > { %v1321_v17 = vsel %vm737_vm0, %v1320_v16, 0.0 }
 0x88f   : > { %1322 = vadd.xlane.f32.xlu1 %v1321_v17 }
 0x902   : > { %v1323_v20 = vpop.xlane.xlu1 %1322 }
 0x903   : > { %v1324_v21 = vmul.f32 0.032258064, %v1323_v20 }
 0x905   : > { %1826 = vrsqrt.f32 %v1324_v21  ;;  %vm1336_vm2 = vcmp.eq.f32.partialorder %v1324_v21, inf  ;;  %v1339_v33 = vand.u32 2147483648, %v1324_v21  ;;  %vm1338_vm3 = vcmp.eq.f32.partialorder %v1324_v21, 0.0 }
 0x90b   : > { %v1827_v22 = vpop.eup %1826 }
 0x90c   : > { %v1330_v23 = vmul.f32 %v1827_v22, %v1324_v21 }
 0x90e   : > { %v1331_v24 = vmul.f32 %v1827_v22, %v1330_v23 }
 0x910   : > { %v1332_v25 = vmul.f32 0.5, %v1331_v24 }
 0x912   : > { %v1333_v28 = vsub.f32 1.5, %v1332_v25 }
 0x914   : > { %v1334_v30 = vmul.f32 %v1827_v22, %v1333_v28 }
 0x916   : > { %v1335_v32 = vmul.f32 %v1334_v30, %v1324_v21 }
 0x918   : > { %v1337_v35 = vsel %vm1336_vm2, %v1324_v21, %v1335_v32 }
 0x919   : > { %v1340_v36 = vsel %vm1338_vm3, %v1339_v33, %v1337_v35 }
 0x91a   : > { %v1341_v37 = vadd.f32 1e-06, %v1340_v36 }
 0x91c   : > { %1828 = vrcp.f32 %v1341_v37  ;;  %v1353_v42 = vand.u32 2147483648, %v1341_v37  ;;  %v1351_v45 = vand.u32 2147483647, %v1341_v37  ;;  %vm1347_vm5 = vweird.f32 %v1341_v37 }
 0x91e   : > { %v1354_v47 = vor.u32 1.1754944e-38, %v1353_v42  ;;  %vm1352_vm7 = vcmp.eq.f32.partialorder %v1351_v45, 8.507059e+37 }
 0x922   : > { %v1829_v38 = vpop.eup %1828 }
 0x923   : > { %v1343_v39 = vmul.f32 %v1829_v38, %v1341_v37  ;;  %vm1348_vm4 = vweird.f32 %v1829_v38 }
 0x924   : > { %vm1349_vm6 = vmor %vm1347_vm5, %vm1348_vm4 }
 0x925   : > { %v1344_v41 = vsub.f32 1.0, %v1343_v39 }
 0x927   : > { %v1345_v44 = vmul.f32 %v1829_v38, %v1344_v41 }
 0x929   : > { %v1346_v46 = vadd.f32 %v1829_v38, %v1345_v44 }
 0x92b   : > { %v1350_v0 = vsel %vm1349_vm6, %v1829_v38, %v1346_v46 }
 0x92c   : > { %v1355_v51 = vsel %vm1352_vm7, %v1354_v47, %v1350_v0 }
 0x92d   : > { %v1356_v52 = vmul.f32 %v1355_v51, %v1328_v48 }
 0x92f   : > { %v1360_v53 = vadd.f32 %v1805_v49, %v1356_v52 }
 0x931   : > { %1676 = vmatmul.msk.f32.vlgmr.msra.gmra.mxu0 %vm737_vm0, %v1360_v53 }
 0x9ae   : > { %v1389_v57 = vpop.f32.mrf.mxu0 }
 0x9af   : > { %v1390_v58 = vadd.f32 %v1806_v56, %v1389_v57 }
 0x9b1   : > { %v1392_v59 = vmax.f32 %v1390_v58, 0.0 }
 0x9b3   : > { %1677 = vmatmul.msk.f32.vlgmr.msrb.gmra.mxu1 %vm1401_vm8, %v1392_v59 }
 0xa30   : > { %v1422_v61 = vpop.f32.mrf.mxu1 }
 0xa31   : > { %v1425_v62 = vadd.f32 %v1422_v61, %v2592_v11 }
 0xa33   : > { %v1430_v63 = vadd.f32 %v1807_v60, %v1425_v62 }
 0xa35   : > { %1431 = vst.msk [vmem:[%s718_s14] sm:$0xff] %vm737_vm0, %v1430_v63 }
 0xa36   : > { %2097 = shalt.err (!%p2094_p8)
}
 0xa37   : > { %1706 = dma.vmem_to_hbm [thread:$0]  (%p2338_p5), %s1446_s4, 128, %s1448_s0, %s1433_s25  }
 0xa38 PF: > { %s2770_s21 = sld [smem:[#allocation24_spill]]  ;;  %p2772_p9 = scmp.ge.s32.totalorder %s2156_s24, 2 }
 0xa3a   : > { %p1735_p12 = pnand %p2772_p9, %p2290_p6 }
 0xa3c   : > { %p1736_p0 = pneg %p1735_p12 }
 0xa3e   : > { %s1459_s17 = sand.u32 1, %s2770_s21  }
 0xa3f   : > { %s1460_s1 = scalar_lea.sflag [#allocation4], %s1459_s17 }
 0xa40   : > { %2139 = dma.done.wait (%p1736_p0), %s1460_s1, 128  }
 0xa41   : > { %2141 = vsyncadd (%p1736_p0), %s1460_s1, 4294967168  ;;  %s2773_s24 = sld [smem:[#allocation26_spill]]  ;;  %s2775_s21 = smov %s2148_s22 }
 0xa42   : > { %s2774_s28 = sld [smem:[#allocation27_spill]]  ;;  %s2776_s22 = smov %s2152_s23 }
 0xa47   : > { %p37_p3 = scmp.ge.s32.totalorder %s2773_s24, 4  }
 0xa48   : > { %s2777_s23 = smov %s2774_s28 }
 0xa49   :  { %39 = sbr.rel (!%p37_p3) target bundleno = 26 (0x1a), region = 198 }
 0xa4e   :  { %1466 = vsyncpa [#allocation3], 1 }
 0xa4f   :  { %1468 = vsyncpa [#allocation3 + $0x1], 1 }
 0xa50   :  { %1469 = vsyncpa [#allocation6], 1 }
 0xa51   :  { %1471 = vsyncpa [#allocation6 + $0x1], 1 }
 0xa52   :  { %1472 = vsyncpa [#allocation9], 1 }
 0xa53   :  { %1474 = vsyncpa [#allocation9 + $0x1], 1 }
 0xa54   :  { %1475 = vsyncpa [#allocation12], 1 }
 0xa55   :  { %1476 = vsyncpa [#allocation15], 1 }
 0xa56   :  { %1477 = vsyncpa [#allocation4], 1 }
 0xa57   :  { %1479 = vsyncpa [#allocation4 + $0x1], 1 }

</bundles_post_ra>
